<compile_context>
chip_gen: v5e
topology: v5e:2x2
jax: 0.10.0
libtpu: 0.0.40
codegen_flags: <defaults>
</compile_context>

<pallas_src>
import numpy as np
import jax
import jax.numpy as jnp
from jax.experimental import pallas as pl
from jax.experimental.pallas import tpu as pltpu

# ---- scaled-down config (original: embed=768, num_filters=256, classes=7) ----
FILTER_SIZES = (2, 3, 4)
MAXK = max(FILTER_SIZES)                       # 4
NUM_FILTERS = 128
NF3 = NUM_FILTERS * len(FILTER_SIZES)          # 384
EMBED = 128
KCOL = MAXK * EMBED                            # im2col K dimension (512)
NUM_CLASSES = 7
OUT_PAD = 128                                  # lane-dense logits slab
SEQ = 16                                       # multiple of 8: reshape stays tile-aligned
BATCH = 2


def _cdiv(a, b):
    return (a + b - 1) // b


def textcnn_kernel(x_ref, w_ref, b_ref, mask_ref, wfc_ref, bfc_ref, out_ref):
    """One batch-tile: (BT*S, MAXK*E) im2col rows -> (BT, 128) padded logits."""
    bt = out_ref.shape[0]
    s = mask_ref.shape[0]

    # Fused "valid" conv over all 3 filter sizes: a single MXU matmul, K=MAXK*E.
    acc = jnp.dot(x_ref[...], w_ref[...],
                  preferred_element_type=jnp.float32)          # (BT*S, 3F) f32
    acc = acc + b_ref[...]                                     # (1, 3F) broadcast

    # Mish with one transcendental:
    #   tanh(softplus(x)) = ((1+e^x)^2 - 1) / ((1+e^x)^2 + 1)
    # exp + approx reciprocal ride the EUP slot; the rest is VPU. Clamp + guard
    # at x > 20 (where tanh(softplus(x)) == 1 to f32 precision) avoids inf/inf.
    t = (1.0 + jnp.exp(jnp.minimum(acc, 20.0))) ** 2
    h = jnp.where(acc > 20.0, acc,
                  acc * (t - 1.0) * pl.reciprocal(t + 1.0, approx=True))

    # Constant additive mask: -1e30 on rows i >= S-k+1 of each filter-size
    # group (which is also exactly where cross-batch / zero-padded im2col rows
    # land), then max-pool over time (sublane-axis reduce -> XLU).
    h3 = h.reshape(bt, s, NF3) + mask_ref[...]                 # mask bcast over batch
    pooled = jnp.max(h3, axis=1)                               # (BT, 3F) f32

    # dropout(p=0.5) in eval mode == identity.  FC in f32 (tiny matmul);
    # lane-dense 128-wide output, wrapper slices [:, :NUM_CLASSES].
    out_ref[...] = jnp.dot(pooled, wfc_ref[...],
                           preferred_element_type=jnp.float32) + bfc_ref[...]


def _prepare_params(params):
    """Fuse conv weights into one (MAXK*E, 3F) bf16 im2col weight (absent taps
    are zero rows), concat conv biases, pad FC to a lane-dense 128-wide out."""
    w2, b2, w3, b3, w4, b4, wfc, bfc = params
    wf = jnp.zeros((MAXK, EMBED, NF3), jnp.float32)
    for g, (k, w) in enumerate(zip(FILTER_SIZES, (w2, w3, w4))):
        wf = wf.at[:k, :, g * NUM_FILTERS:(g + 1) * NUM_FILTERS].set(w)
    wf = wf.reshape(KCOL, NF3).astype(jnp.bfloat16)
    bf = jnp.concatenate([b2, b3, b4], axis=1).astype(jnp.float32)       # (1, 3F)
    wfc_p = jnp.zeros((NF3, OUT_PAD), jnp.float32).at[:, :NUM_CLASSES].set(wfc)
    bfc_p = jnp.zeros((1, OUT_PAD), jnp.float32).at[:, :NUM_CLASSES].set(bfc)
    return wf, bf, wfc_p, bfc_p


def _build_mask():
    """Compile-time (S, 3F) additive mask: 0 on valid conv rows, -1e30 past
    L_k = S - k + 1 for each filter-size group."""
    mask = np.zeros((SEQ, NF3), np.float32)
    for g, k in enumerate(FILTER_SIZES):
        mask[SEQ - k + 1:, g * NUM_FILTERS:(g + 1) * NUM_FILTERS] = -1e30
    return jnp.asarray(mask)


def textcnn_forward(x, params):
    B, S, E = x.shape
    assert (S, E) == (SEQ, EMBED)
    wf, bf, wfc_p, bfc_p = _prepare_params(params)
    mask = _build_mask()

    # Batch-tile sizing: each grid step processes B_TILE batch items
    # (B_TILE*S matmul rows); the axis is "parallel" so v7x megacore can shard
    # it.  Here B=2 -> one step; for larger B this targets >=256 rows/step.
    B_TILE = min(B, max(1, 256 // S))
    n_tiles = _cdiv(B, B_TILE)
    B_pad = n_tiles * B_TILE

    # im2col in the wrapper: column block j of row (b*S + i) is x[b, i+j, :].
    # Cross-batch / zero-padded rows only ever feed masked pool positions, and
    # padded batch items are sliced away below.
    xb = jnp.pad(x, ((0, B_pad - B), (0, 0), (0, 0))).astype(jnp.bfloat16)
    x2 = xb.reshape(B_pad * S, E)
    x2 = jnp.pad(x2, ((0, MAXK - 1), (0, 0)))
    x_im2col = jnp.concatenate([x2[j:j + B_pad * S] for j in range(MAXK)],
                               axis=1)                          # (B_pad*S, MAXK*E)

    rows = B_TILE * S

    def inv(shape):                   # grid-invariant operand (weights / consts)
        return pl.BlockSpec(shape, lambda i: (0,) * len(shape))

    out = pl.pallas_call(
        textcnn_kernel,
        out_shape=jax.ShapeDtypeStruct((B_pad, OUT_PAD), jnp.float32),
        grid_spec=pltpu.PrefetchScalarGridSpec(
            num_scalar_prefetch=0,
            grid=(n_tiles,),
            in_specs=[
                pl.BlockSpec((rows, KCOL), lambda i: (i, 0)),   # im2col rows
                inv(wf.shape), inv(bf.shape), inv(mask.shape),
                inv(wfc_p.shape), inv(bfc_p.shape),
            ],
            out_specs=pl.BlockSpec((B_TILE, OUT_PAD), lambda i: (i, 0)),
        ),
        compiler_params=pltpu.CompilerParams(
            dimension_semantics=("parallel",)),
    )(x_im2col, wf, bf, mask, wfc_p, bfc_p)
    return out[:B, :NUM_CLASSES]


def reference_forward(x, params):
    """Plain-JAX reference mirroring the PyTorch forward (eval mode), f32."""
    w2, b2, w3, b3, w4, b4, wfc, bfc = params
    hp = jax.lax.Precision.HIGHEST
    outs = []
    for k, (w, b) in zip(FILTER_SIZES, ((w2, b2), (w3, b3), (w4, b4))):
        L = x.shape[1] - k + 1
        acc = jnp.zeros((x.shape[0], L, NUM_FILTERS), jnp.float32)
        for j in range(k):
            acc = acc + jnp.einsum("ble,ef->blf", x[:, j:j + L, :], w[j],
                                   precision=hp)
        acc = acc + b[None, :, :]
        h = acc * jnp.tanh(jax.nn.softplus(acc))
        outs.append(jnp.max(h, axis=1))
    feat = jnp.concatenate(outs, axis=1)
    return jnp.dot(feat, wfc, precision=hp) + bfc


def init_params(key):
    """Deterministic synthetic parameters.

    Conv2d weight (F, 1, k, E) is stored as (k, E, F): W[j, e, f] = W_torch[f, 0, j, e].
    Linear weight (C, 3F) is stored transposed as (3F, C).
    """
    keys = jax.random.split(key, 8)
    params = []
    for i, k in enumerate(FILTER_SIZES):
        fan_in = k * EMBED
        w = jax.random.normal(keys[2 * i], (k, EMBED, NUM_FILTERS),
                              jnp.float32) * (1.0 / jnp.sqrt(fan_in))
        b = jax.random.normal(keys[2 * i + 1], (1, NUM_FILTERS),
                              jnp.float32) * 0.01
        params.extend([w, b])
    in_f = NUM_FILTERS * len(FILTER_SIZES)
    wfc = jax.random.normal(keys[6], (in_f, NUM_CLASSES),
                            jnp.float32) * (1.0 / jnp.sqrt(in_f))
    bfc = jax.random.normal(keys[7], (1, NUM_CLASSES), jnp.float32) * 0.01
    params.extend([wfc, bfc])
    return tuple(params)


if __name__ == "__main__":
    key = jax.random.PRNGKey(0)
    k_x, k_p = jax.random.split(key)
    # x stands in for the BERT sequence output: (B, S, E)
    x = jax.random.normal(k_x, (BATCH, SEQ, EMBED), jnp.float32)
    params = init_params(k_p)

    out = jax.block_until_ready(textcnn_forward(x, params))

    ref = reference_forward(x, params)
    assert out.shape == (BATCH, NUM_CLASSES)
    assert jnp.allclose(out, ref, rtol=2e-2, atol=2e-2), (out, ref)

    print("KERNEL_OK")
</pallas_src>

<mosaic_0001>
module attributes {stable_mosaic.version = 11 : i64} {
  func.func @textcnn_kernel(%arg0: i32, %arg1: memref<32x512xbf16, #tpu.memory_space<vmem>>, %arg2: memref<512x384xbf16, #tpu.memory_space<vmem>>, %arg3: memref<1x384xf32, #tpu.memory_space<vmem>>, %arg4: memref<16x384xf32, #tpu.memory_space<vmem>>, %arg5: memref<384x128xf32, #tpu.memory_space<vmem>>, %arg6: memref<1x128xf32, #tpu.memory_space<vmem>>, %arg7: memref<2x128xf32, #tpu.memory_space<vmem>>) attributes {dimension_semantics = [#tpu.dimension_semantics<parallel>], iteration_bounds = array<i64: 1>, scalar_prefetch = 0 : i64, scratch_operands = 0 : i64, tpu.core_type = #tpu.core_type<tc>, window_params = [{transform_indices = @transform_0, window_bounds = array<i64: 32, 512>}, {pipeline_mode = #tpu.pipeline_mode<synchronous>, transform_indices = @transform_1, window_bounds = array<i64: 512, 384>}, {pipeline_mode = #tpu.pipeline_mode<synchronous>, transform_indices = @transform_2, window_bounds = array<i64: 1, 384>}, {pipeline_mode = #tpu.pipeline_mode<synchronous>, transform_indices = @transform_3, window_bounds = array<i64: 16, 384>}, {pipeline_mode = #tpu.pipeline_mode<synchronous>, transform_indices = @transform_4, window_bounds = array<i64: 384, 128>}, {pipeline_mode = #tpu.pipeline_mode<synchronous>, transform_indices = @transform_5, window_bounds = array<i64: 1, 128>}, {transform_indices = @transform_6, window_bounds = array<i64: 2, 128>}]} {
    %c0 = arith.constant 0 : index
    %c0_0 = arith.constant 0 : index
    %0 = vector.load %arg1[%c0, %c0_0] : memref<32x512xbf16, #tpu.memory_space<vmem>>, vector<32x512xbf16>
    %c0_1 = arith.constant 0 : index
    %c0_2 = arith.constant 0 : index
    %1 = vector.load %arg2[%c0_1, %c0_2] : memref<512x384xbf16, #tpu.memory_space<vmem>>, vector<512x384xbf16>
    %cst = arith.constant dense<0.000000e+00> : vector<32x384xf32>
    %2 = tpu.matmul %0, %1, %cst {dimension_numbers = #tpu.dot_dimension_numbers<[1], [0], [0], [1], [0, 0, 1, 1], [], []>} : vector<32x512xbf16>, vector<512x384xbf16>, vector<32x384xf32> -> vector<32x384xf32>
    %c0_3 = arith.constant 0 : index
    %c0_4 = arith.constant 0 : index
    %3 = vector.load %arg3[%c0_3, %c0_4] : memref<1x384xf32, #tpu.memory_space<vmem>>, vector<1x384xf32>
    %4 = vector.broadcast %3 : vector<1x384xf32> to vector<32x384xf32>
    %5 = arith.addf %2, %4 : vector<32x384xf32>
    %cst_5 = arith.constant 2.000000e+01 : f32
    %6 = vector.broadcast %cst_5 : f32 to vector<32x384xf32>
    %7 = arith.minimumf %5, %6 : vector<32x384xf32>
    %8 = math.exp %7 : vector<32x384xf32>
    %cst_6 = arith.constant 1.000000e+00 : f32
    %9 = vector.broadcast %cst_6 : f32 to vector<32x384xf32>
    %10 = arith.addf %9, %8 : vector<32x384xf32>
    %11 = arith.mulf %10, %10 : vector<32x384xf32>
    %cst_7 = arith.constant 2.000000e+01 : f32
    %12 = vector.broadcast %cst_7 : f32 to vector<32x384xf32>
    %13 = arith.cmpf ogt, %5, %12 : vector<32x384xf32>
    %cst_8 = arith.constant 1.000000e+00 : f32
    %14 = vector.broadcast %cst_8 : f32 to vector<32x384xf32>
    %15 = arith.subf %11, %14 : vector<32x384xf32>
    %16 = arith.mulf %5, %15 : vector<32x384xf32>
    %cst_9 = arith.constant 1.000000e+00 : f32
    %17 = vector.broadcast %cst_9 : f32 to vector<32x384xf32>
    %18 = arith.addf %11, %17 : vector<32x384xf32>
    %19 = tpu.reciprocal %18 {approx = true} : vector<32x384xf32> -> vector<32x384xf32>
    %20 = arith.mulf %16, %19 : vector<32x384xf32>
    %21 = arith.select %13, %5, %20 : vector<32x384xi1>, vector<32x384xf32>
    %22 = vector.shape_cast %21 : vector<32x384xf32> to vector<2x16x384xf32>
    %c0_10 = arith.constant 0 : index
    %c0_11 = arith.constant 0 : index
    %23 = vector.load %arg4[%c0_10, %c0_11] : memref<16x384xf32, #tpu.memory_space<vmem>>, vector<16x384xf32>
    %24 = vector.shape_cast %23 : vector<16x384xf32> to vector<1x16x384xf32>
    %25 = vector.broadcast %24 : vector<1x16x384xf32> to vector<2x16x384xf32>
    %26 = arith.addf %22, %25 : vector<2x16x384xf32>
    %cst_12 = arith.constant dense<0xFF800000> : vector<2x384xf32>
    %27 = vector.multi_reduction <maximumf>, %26, %cst_12 [1] : vector<2x16x384xf32> to vector<2x384xf32>
    %c0_13 = arith.constant 0 : index
    %c0_14 = arith.constant 0 : index
    %28 = vector.load %arg5[%c0_13, %c0_14] : memref<384x128xf32, #tpu.memory_space<vmem>>, vector<384x128xf32>
    %cst_15 = arith.constant dense<0.000000e+00> : vector<2x128xf32>
    %29 = tpu.matmul %27, %28, %cst_15 {dimension_numbers = #tpu.dot_dimension_numbers<[1], [0], [0], [1], [0, 0, 1, 1], [], []>} : vector<2x384xf32>, vector<384x128xf32>, vector<2x128xf32> -> vector<2x128xf32>
    %c0_16 = arith.constant 0 : index
    %c0_17 = arith.constant 0 : index
    %30 = vector.load %arg6[%c0_16, %c0_17] : memref<1x128xf32, #tpu.memory_space<vmem>>, vector<1x128xf32>
    %31 = vector.broadcast %30 : vector<1x128xf32> to vector<2x128xf32>
    %32 = arith.addf %29, %31 : vector<2x128xf32>
    %c0_18 = arith.constant 0 : index
    %c0_19 = arith.constant 0 : index
    %33 = vector.load %arg7[%c0_18, %c0_19] : memref<2x128xf32, #tpu.memory_space<vmem>>, vector<2x128xf32>
    tpu.vector_store %arg7[%c0_18, %c0_19], %32 {strides = array<i32>} : memref<2x128xf32, #tpu.memory_space<vmem>>, vector<2x128xf32>,
    return
  }
  func.func @transform_0(%arg0: i32) -> (i32, i32) {
    %c0_i32 = arith.constant 0 : i32
    %c0_i32_0 = arith.constant 0 : i32
    return %arg0, %c0_i32 : i32, i32
  }
  func.func @transform_1(%arg0: i32) -> (i32, i32) {
    %c0_i32 = arith.constant 0 : i32
    %c0_i32_0 = arith.constant 0 : i32
    %c0_i32_1 = arith.constant 0 : i32
    return %c0_i32, %c0_i32_0 : i32, i32
  }
  func.func @transform_2(%arg0: i32) -> (i32, i32) {
    %c0_i32 = arith.constant 0 : i32
    %c0_i32_0 = arith.constant 0 : i32
    %c0_i32_1 = arith.constant 0 : i32
    return %c0_i32, %c0_i32_0 : i32, i32
  }
  func.func @transform_3(%arg0: i32) -> (i32, i32) {
    %c0_i32 = arith.constant 0 : i32
    %c0_i32_0 = arith.constant 0 : i32
    %c0_i32_1 = arith.constant 0 : i32
    return %c0_i32, %c0_i32_0 : i32, i32
  }
  func.func @transform_4(%arg0: i32) -> (i32, i32) {
    %c0_i32 = arith.constant 0 : i32
    %c0_i32_0 = arith.constant 0 : i32
    %c0_i32_1 = arith.constant 0 : i32
    return %c0_i32, %c0_i32_0 : i32, i32
  }
  func.func @transform_5(%arg0: i32) -> (i32, i32) {
    %c0_i32 = arith.constant 0 : i32
    %c0_i32_0 = arith.constant 0 : i32
    %c0_i32_1 = arith.constant 0 : i32
    return %c0_i32, %c0_i32_0 : i32, i32
  }
  func.func @transform_6(%arg0: i32) -> (i32, i32) {
    %c0_i32 = arith.constant 0 : i32
    %c0_i32_0 = arith.constant 0 : i32
    return %arg0, %c0_i32 : i32, i32
  }
}

</mosaic_0001>

<bundles_post_ra>
// kernel: tpu_custom_call.1
= control target key start
LH: loop header
LB: loop body
LE: loop exit
PB: predicated region body
PF: predicated region fallthrough
CT: control target
= control target key end

     0   :  { %11 = vsyncpa [#allocation3], 0  ;;  %s2334_s0 = inlined_call_operand.hbm [shape: bf16[32,512], index: 0, kind: input, shape index: {}]   ;;  %s2335_s1 = inlined_call_operand.hbm [shape: bf16[512,384], index: 1, kind: input, shape index: {}]   ;;  %s2336_s2 = inlined_call_operand.hbm [shape: f32[1,384], index: 2, kind: input, shape index: {}]   ;;  %s2337_s3 = inlined_call_operand.hbm [shape: f32[16,384], index: 3, kind: input, shape index: {}]   ;;  %s2338_s4 = inlined_call_operand.hbm [shape: f32[384,128], index: 4, kind: input, shape index: {}]   ;;  %s2339_s5 = inlined_call_operand.vmem [shape: f32[1,128], index: 5, kind: input, shape index: {}]   ;;  %s2340_s6 = inlined_call_operand.hbm [shape: f32[2,128], index: 6, kind: output, shape index: {}]  }
   0x1   :  { %12 = vsyncpa [#allocation6], 0 }
   0x2   :  { %13 = vsyncpa [#allocation9], 0  ;;  %s32_s23 = sshll.u32 %s2335_s1, 4  ;;  %s33_s23 = int_to_ptr.hbm [resolvable:$true] %s32_s23 }
   0x3   :  { %14 = vsyncpa [#allocation4], 0  ;;  %s2120_s24 = smov [#allocation5]   ;;  %s56_s28 = sshll.u32 %s2337_s3, 4  ;;  %s57_s28 = int_to_ptr.hbm [resolvable:$true] %s56_s28 }
   0x4   :  { %s34_s25 = sshll.u32 %s2120_s24, 4  ;;  %s2121_s29 = smov 192   ;;  %s35_s25 = int_to_ptr.vmem [resolvable:$true] %s34_s25 }
   0x5   :  { %s2122_s30 = smov 12   ;;  %s2123_s7 = smov [#allocation8]  }
   0x6   :  { %40 = dma.hbm_to_vmem [thread:$0]  %s33_s23, 12288, %s35_s25, [#allocation6], %s2121_s29, %s2121_s29, %s2122_s30  }
   0x7   :  { %s58_s8 = sshll.u32 %s2123_s7, 4  ;;  %s2124_s9 = smov 384   ;;  %s59_s8 = int_to_ptr.vmem [resolvable:$true] %s58_s8 }
   0x8   :  { %s2125_s10 = smov 24   ;;  %s19_s12 = sshll.u32 %s2334_s0, 4  ;;  %s20_s12 = int_to_ptr.hbm [resolvable:$true] %s19_s12 }
   0x9   :  { %64 = dma.hbm_to_vmem [thread:$0]  %s57_s28, 768, %s59_s8, [#allocation9], %s2124_s9, %s2124_s9, %s2125_s10  }
   0xa   :  { %s2126_s13 = smov [#allocation2]   ;;  %s46_s16 = sshll.u32 %s2336_s2, 4  ;;  %s47_s16 = int_to_ptr.hbm [resolvable:$true] %s46_s16 }
   0xb   :  { %s21_s14 = sshll.u32 %s2126_s13, 4  ;;  %s2127_s17 = smov 256   ;;  %s22_s14 = int_to_ptr.vmem [resolvable:$true] %s21_s14 }
   0xc   :  { %s2128_s18 = smov 16   ;;  %s2129_s19 = smov [#allocation7]  }
   0xd   :  { %27 = dma.hbm_to_vmem [thread:$0]  %s20_s12, 1024, %s22_s14, [#allocation3], %s2127_s17, %s2127_s17, %s2128_s18  }
   0xe   :  { %s48_s20 = sshll.u32 %s2129_s19, 4  ;;  %s69_s23 = sshll.u32 %s2338_s4, 4  ;;  %s49_s20 = int_to_ptr.vmem [resolvable:$true] %s48_s20  ;;  %s70_s23 = int_to_ptr.hbm [resolvable:$true] %s69_s23 }
   0xf   :  { %51 = dma.hbm_to_vmem [thread:$0]  %s47_s16, 48, %s49_s20, [#allocation6]  }
  0x10   :  { %s2130_s0 = smov [#allocation10]   ;;  %s2131_s25 = smov 128  }
  0x11   :  { %s71_s24 = sshll.u32 %s2130_s0, 4  ;;  %s2132_s26 = smov 8   ;;  %s72_s24 = int_to_ptr.vmem [resolvable:$true] %s71_s24 }
  0x12   :  { %77 = dma.hbm_to_vmem [thread:$0]  %s70_s23, 6144, %s72_s24, [#allocation9], %s2131_s25, %s2131_s25, %s2132_s26  }
  0x13   :  { %2112 = dma.done.wait [#allocation3], 1024  }
  0x14   :  { %2113 = vsyncadd [#allocation3], 4294966272 }
  0x15   :  { %2114 = dma.done.wait [#allocation6], 12336  }
  0x16   :  { %2115 = vsyncadd [#allocation6], 4294954960 }
  0x17   :  { %2116 = dma.done.wait [#allocation9], 6912  }
  0x18   :  { %2117 = vsyncadd [#allocation9], 4294960384  ;;  %v1491_v0 = vld [vmem:[#allocation5 + $0xa8] sm:$0xf]  ;;  %v1831_v1 = vld [vmem:[#allocation5 + $0xb0] sm:$0xf0] }
  0x19   :  { %v1587_v2 = vld [vmem:[#allocation5 + $0x168] sm:$0xf]  ;;  %v1492_v3 = vor.u32 %v1831_v1, %v1491_v0  ;;  %v1855_v4 = vld [vmem:[#allocation5 + $0x170] sm:$0xf0]  ;;  %v1479_v11 = vld [vmem:[#allocation5 + $0x90] sm:$0xf] }
  0x1a   :  { %v1683_v5 = vld [vmem:[#allocation5 + $0x228] sm:$0xf]  ;;  %v1879_v6 = vld [vmem:[#allocation5 + $0x230] sm:$0xf0]  ;;  %v1588_v7 = vor.u32 %v1855_v4, %v1587_v2  ;;  %v1828_v13 = vld [vmem:[#allocation5 + $0x98] sm:$0xf0] }
  0x1b   :  { %v1684_v8 = vor.u32 %v1879_v6, %v1683_v5  ;;  %v1779_v9 = vld [vmem:[#allocation5 + $0x2e8] sm:$0xf]  ;;  %v1903_v10 = vld [vmem:[#allocation5 + $0x2f0] sm:$0xf0]  ;;  %796 = vmatpush.bf16.msra.mxu0 %v1492_v3  ;;  %v1575_v14 = vld [vmem:[#allocation5 + $0x150] sm:$0xf]  ;;  %v1480_v16 = vor.u32 %v1828_v13, %v1479_v11 }
  0x1c   :  { %v1780_v12 = vor.u32 %v1903_v10, %v1779_v9  ;;  %v1852_v15 = vld [vmem:[#allocation5 + $0x158] sm:$0xf0]  ;;  %815 = vmatpush.bf16.msra.mxu1 %v1588_v7  ;;  %v1671_v18 = vld [vmem:[#allocation5 + $0x210] sm:$0xf]  ;;  %v1467_v23 = vld [vmem:[#allocation5 + $0x78] sm:$0xf] }
  0x1d   :  { %834 = vmatpush.bf16.msra.mxu2 %v1684_v8  ;;  %v1576_v17 = vor.u32 %v1852_v15, %v1575_v14  ;;  %v1876_v19 = vld [vmem:[#allocation5 + $0x218] sm:$0xf0]  ;;  %v1767_v20 = vld [vmem:[#allocation5 + $0x2d0] sm:$0xf]  ;;  %v1825_v24 = vld [vmem:[#allocation5 + $0x80] sm:$0xf0] }
  0x1e   :  { %853 = vmatpush.bf16.msra.mxu3 %v1780_v12  ;;  %v1672_v21 = vor.u32 %v1876_v19, %v1671_v18  ;;  %v1900_v22 = vld [vmem:[#allocation5 + $0x2d8] sm:$0xf0]  ;;  %v1563_v26 = vld [vmem:[#allocation5 + $0x138] sm:$0xf]  ;;  %v1849_v27 = vld [vmem:[#allocation5 + $0x140] sm:$0xf0]  ;;  %v1468_v29 = vor.u32 %v1825_v24, %v1467_v23 }
  0x1f   :  { %v1768_v25 = vor.u32 %v1900_v22, %v1767_v20  ;;  %v1659_v28 = vld [vmem:[#allocation5 + $0x1f8] sm:$0xf]  ;;  %797 = vmatpush.bf16.msra.mxu0 %v1480_v16  ;;  %v1873_v30 = vld [vmem:[#allocation5 + $0x200] sm:$0xf0]  ;;  %v1564_v33 = vor.u32 %v1849_v27, %v1563_v26  ;;  %v1455_v35 = vld [vmem:[#allocation5 + $0x60] sm:$0xf] }
  0x20   :  { %v1755_v31 = vld [vmem:[#allocation5 + $0x2b8] sm:$0xf]  ;;  %v1897_v32 = vld [vmem:[#allocation5 + $0x2c0] sm:$0xf0]  ;;  %816 = vmatpush.bf16.msra.mxu1 %v1576_v17  ;;  %v1660_v34 = vor.u32 %v1873_v30, %v1659_v28  ;;  %v1822_v36 = vld [vmem:[#allocation5 + $0x68] sm:$0xf0] }
  0x21   :  { %835 = vmatpush.bf16.msra.mxu2 %v1672_v21  ;;  %v1551_v37 = vld [vmem:[#allocation5 + $0x120] sm:$0xf]  ;;  %v1756_v38 = vor.u32 %v1897_v32, %v1755_v31  ;;  %v1846_v39 = vld [vmem:[#allocation5 + $0x128] sm:$0xf0]  ;;  %v1456_v44 = vor.u32 %v1822_v36, %v1455_v35  ;;  %v1443_v47 = vld [vmem:[#allocation5 + $0x48] sm:$0xf] }
  0x22   :  { %854 = vmatpush.bf16.msra.mxu3 %v1768_v25  ;;  %v1647_v40 = vld [vmem:[#allocation5 + $0x1e0] sm:$0xf]  ;;  %v1870_v41 = vld [vmem:[#allocation5 + $0x1e8] sm:$0xf0]  ;;  %v1552_v45 = vor.u32 %v1846_v39, %v1551_v37  ;;  %v1819_v48 = vld [vmem:[#allocation5 + $0x50] sm:$0xf0] }
  0x23   :  { %v1743_v42 = vld [vmem:[#allocation5 + $0x2a0] sm:$0xf]  ;;  %v1894_v43 = vld [vmem:[#allocation5 + $0x2a8] sm:$0xf0]  ;;  %798 = vmatpush.bf16.msra.mxu0 %v1468_v29  ;;  %v1648_v46 = vor.u32 %v1870_v41, %v1647_v40  ;;  %v1539_v49 = vld [vmem:[#allocation5 + $0x108] sm:$0xf]  ;;  %v1444_v56 = vor.u32 %v1819_v48, %v1443_v47 }
  0x24   :  { %817 = vmatpush.bf16.msra.mxu1 %v1564_v33  ;;  %v1744_v50 = vor.u32 %v1894_v43, %v1743_v42  ;;  %v1843_v51 = vld [vmem:[#allocation5 + $0x110] sm:$0xf0]  ;;  %v1635_v52 = vld [vmem:[#allocation5 + $0x1c8] sm:$0xf]  ;;  %v1431_v59 = vld [vmem:[#allocation5 + $0x30] sm:$0xf] }
  0x25   :  { %836 = vmatpush.bf16.msra.mxu2 %v1660_v34  ;;  %v1867_v53 = vld [vmem:[#allocation5 + $0x1d0] sm:$0xf0]  ;;  %v1731_v54 = vld [vmem:[#allocation5 + $0x288] sm:$0xf]  ;;  %v1540_v57 = vor.u32 %v1843_v51, %v1539_v49  ;;  %v1816_v60 = vld [vmem:[#allocation5 + $0x38] sm:$0xf0] }
  0x26   :  { %855 = vmatpush.bf16.msra.mxu3 %v1756_v38  ;;  %v1891_v55 = vld [vmem:[#allocation5 + $0x290] sm:$0xf0]  ;;  %v1636_v58 = vor.u32 %v1867_v53, %v1635_v52  ;;  %v1527_v61 = vld [vmem:[#allocation5 + $0xf0] sm:$0xf]  ;;  %v1840_v63 = vld [vmem:[#allocation5 + $0xf8] sm:$0xf0]  ;;  %v1432_v4 = vor.u32 %v1816_v60, %v1431_v59 }
  0x27   :  { %799 = vmatpush.bf16.msra.mxu0 %v1456_v44  ;;  %v1732_v62 = vor.u32 %v1891_v55, %v1731_v54  ;;  %v1623_v0 = vld [vmem:[#allocation5 + $0x1b0] sm:$0xf]  ;;  %v1864_v1 = vld [vmem:[#allocation5 + $0x1b8] sm:$0xf0]  ;;  %v1528_v5 = vor.u32 %v1840_v63, %v1527_v61  ;;  %v1419_v7 = vld [vmem:[#allocation5 + $0x18] sm:$0xf] }
  0x28   :  { %818 = vmatpush.bf16.msra.mxu1 %v1552_v45  ;;  %v1719_v2 = vld [vmem:[#allocation5 + $0x270] sm:$0xf]  ;;  %v1888_v3 = vld [vmem:[#allocation5 + $0x278] sm:$0xf0]  ;;  %v1624_v6 = vor.u32 %v1864_v1, %v1623_v0  ;;  %v1813_v8 = vld [vmem:[#allocation5 + $0x20] sm:$0xf0] }
  0x29   :  { %837 = vmatpush.bf16.msra.mxu2 %v1648_v46  ;;  %v1515_v9 = vld [vmem:[#allocation5 + $0xd8] sm:$0xf]  ;;  %v1720_v10 = vor.u32 %v1888_v3, %v1719_v2  ;;  %v1837_v11 = vld [vmem:[#allocation5 + $0xe0] sm:$0xf0]  ;;  %v1407_v16 = vld [vmem:[#allocation5] sm:$0xf]  ;;  %v1420_v17 = vor.u32 %v1813_v8, %v1419_v7 }
  0x2a   :  { %856 = vmatpush.bf16.msra.mxu3 %v1744_v50  ;;  %v1611_v12 = vld [vmem:[#allocation5 + $0x198] sm:$0xf]  ;;  %v1861_v13 = vld [vmem:[#allocation5 + $0x1a0] sm:$0xf0]  ;;  %v1810_v18 = vld [vmem:[#allocation5 + $0x8] sm:$0xf0]  ;;  %v1516_v21 = vor.u32 %v1837_v11, %v1515_v9 }
  0x2b   :  { %800 = vmatpush.bf16.msra.mxu0 %v1444_v56  ;;  %v1707_v14 = vld [vmem:[#allocation5 + $0x258] sm:$0xf]  ;;  %v1885_v15 = vld [vmem:[#allocation5 + $0x260] sm:$0xf0]  ;;  %v1503_v19 = vld [vmem:[#allocation5 + $0xc0] sm:$0xf]  ;;  %v1612_v22 = vor.u32 %v1861_v13, %v1611_v12  ;;  %v1408_v34 = vor.u32 %v1810_v18, %v1407_v16 }
  0x2c   :  { %819 = vmatpush.bf16.msra.mxu1 %v1540_v57  ;;  %v1834_v20 = vld [vmem:[#allocation5 + $0xc8] sm:$0xf0]  ;;  %v1599_v23 = vld [vmem:[#allocation5 + $0x180] sm:$0xf]  ;;  %v1708_v26 = vor.u32 %v1885_v15, %v1707_v14  ;;  %v1803_v29 = vld [vmem:[#allocation2 + $0xc] sm:$0xf0] }
  0x2d   :  { %838 = vmatpush.bf16.msra.mxu2 %v1636_v58  ;;  %v1858_v24 = vld [vmem:[#allocation5 + $0x188] sm:$0xf0]  ;;  %v1695_v25 = vld [vmem:[#allocation5 + $0x240] sm:$0xf]  ;;  %v1801_v30 = vld [vmem:[#allocation2 + $0x4] sm:$0xf]  ;;  %v1504_v38 = vor.u32 %v1834_v20, %v1503_v19 }
  0x2e   :  { %857 = vmatpush.bf16.msra.mxu3 %v1732_v62  ;;  %v1882_v27 = vld [vmem:[#allocation5 + $0x248] sm:$0xf0]  ;;  %v1375_v28 = vld [vmem:[#allocation2] sm:$0xf]  ;;  %v1377_v31 = vld [vmem:[#allocation2 + $0x10] sm:$0xf0]  ;;  %v1600_v39 = vor.u32 %v1858_v24, %v1599_v23 }
  0x2f   :  { %801 = vmatpush.bf16.msra.mxu0 %v1432_v4  ;;  %v1878_v32 = vld [vmem:[#allocation5 + $0x22c] sm:$0xf]  ;;  %v1685_v33 = vld [vmem:[#allocation5 + $0x234] sm:$0xf0]  ;;  %v1383_v35 = vld [vmem:[#allocation2 + $0x8] sm:$0xf]  ;;  %v1696_v43 = vor.u32 %v1882_v27, %v1695_v25  ;;  %v2184_v48 = vor.u32 %v1803_v29, %v1375_v28  ;;  %v2186_v53 = vor.u32 %v1801_v30, %v1377_v31 }
  0x30   :  { %820 = vmatpush.bf16.msra.mxu1 %v1528_v5  ;;  %v1854_v36 = vld [vmem:[#allocation5 + $0x16c] sm:$0xf]  ;;  %v1589_v37 = vld [vmem:[#allocation5 + $0x174] sm:$0xf0]  ;;  %v1385_v42 = vld [vmem:[#allocation2 + $0x18] sm:$0xf0]  ;;  %v1688_v44 = vor.u32 %v1878_v32, %v1685_v33 }
  0x31   :  { %839 = vmatpush.bf16.msra.mxu2 %v1624_v6  ;;  %v1804_v40 = vld [vmem:[#allocation2 + $0x14] sm:$0xf0]  ;;  %v1802_v41 = vld [vmem:[#allocation2 + $0xc] sm:$0xf]  ;;  %v1592_v49 = vor.u32 %v1854_v36, %v1589_v37  ;;  %v1875_v51 = vld [vmem:[#allocation5 + $0x214] sm:$0xf] }
  0x32   :  { %858 = vmatpush.bf16.msra.mxu3 %v1720_v10  ;;  %v1830_v45 = vld [vmem:[#allocation5 + $0xac] sm:$0xf]  ;;  %v1493_v46 = vld [vmem:[#allocation5 + $0xb4] sm:$0xf0]  ;;  %v1673_v52 = vld [vmem:[#allocation5 + $0x21c] sm:$0xf0]  ;;  %v2188_v54 = vor.u32 %v1804_v40, %v1383_v35  ;;  %v2190_v57 = vor.u32 %v1802_v41, %v1385_v42 }
  0x33   :  { %802 = vmatpush.bf16.msra.mxu0 %v1420_v17  ;;  %v1902_v47 = vld [vmem:[#allocation5 + $0x2ec] sm:$0xf]  ;;  %v1781_v50 = vld [vmem:[#allocation5 + $0x2f4] sm:$0xf0]  ;;  %v1851_v55 = vld [vmem:[#allocation5 + $0x154] sm:$0xf]  ;;  %v1496_v58 = vor.u32 %v1830_v45, %v1493_v46  ;;  %v1676_v60 = vor.u32 %v1875_v51, %v1673_v52 }
  0x34   :  { %821 = vmatpush.bf16.msra.mxu1 %v1516_v21  ;;  %v1577_v56 = vld [vmem:[#allocation5 + $0x15c] sm:$0xf0]  ;;  %v1784_v59 = vor.u32 %v1902_v47, %v1781_v50  ;;  %v1827_v61 = vld [vmem:[#allocation5 + $0x94] sm:$0xf]  ;;  %v1872_v2 = vld [vmem:[#allocation5 + $0x1fc] sm:$0xf] }
  0x35   :  { %840 = vmatpush.bf16.msra.mxu2 %v1612_v22  ;;  %v1481_v62 = vld [vmem:[#allocation5 + $0x9c] sm:$0xf0]  ;;  %v1899_v63 = vld [vmem:[#allocation5 + $0x2d4] sm:$0xf]  ;;  %v1580_v0 = vor.u32 %v1851_v55, %v1577_v56  ;;  %v1661_v3 = vld [vmem:[#allocation5 + $0x204] sm:$0xf0] }
  0x36   :  { %859 = vmatpush.bf16.msra.mxu3 %v1708_v26  ;;  %v1769_v1 = vld [vmem:[#allocation5 + $0x2dc] sm:$0xf0]  ;;  %v1848_v4 = vld [vmem:[#allocation5 + $0x13c] sm:$0xf]  ;;  %v1565_v5 = vld [vmem:[#allocation5 + $0x144] sm:$0xf0]  ;;  %v1484_v6 = vor.u32 %v1827_v61, %v1481_v62  ;;  %v1664_v8 = vor.u32 %v1872_v2, %v1661_v3 }
  0x37   :  { %803 = vmatpush.bf16.msra.mxu0 %v1408_v34  ;;  %v1772_v7 = vor.u32 %v1899_v63, %v1769_v1  ;;  %v1824_v9 = vld [vmem:[#allocation5 + $0x7c] sm:$0xf]  ;;  %v1469_v10 = vld [vmem:[#allocation5 + $0x84] sm:$0xf0]  ;;  %v1568_v12 = vor.u32 %v1848_v4, %v1565_v5  ;;  %v1869_v14 = vld [vmem:[#allocation5 + $0x1e4] sm:$0xf] }
  0x38   :  { %822 = vmatpush.bf16.msra.mxu1 %v1504_v38  ;;  %v1896_v11 = vld [vmem:[#allocation5 + $0x2bc] sm:$0xf]  ;;  %v1757_v13 = vld [vmem:[#allocation5 + $0x2c4] sm:$0xf0]  ;;  %v1649_v15 = vld [vmem:[#allocation5 + $0x1ec] sm:$0xf0]  ;;  %v1472_v18 = vor.u32 %v1824_v9, %v1469_v10 }
  0x39   :  { %841 = vmatpush.bf16.msra.mxu2 %v1600_v39  ;;  %v1845_v16 = vld [vmem:[#allocation5 + $0x124] sm:$0xf]  ;;  %v1553_v17 = vld [vmem:[#allocation5 + $0x12c] sm:$0xf0]  ;;  %v1760_v22 = vor.u32 %v1896_v11, %v1757_v13  ;;  %v1652_v23 = vor.u32 %v1869_v14, %v1649_v15  ;;  %v1391_v25 = vld [vmem:[#allocation2 + $0x20] sm:$0xf] }
  0x3a   :  { %860 = vmatpush.bf16.msra.mxu3 %v1696_v43  ;;  %804 = vmatmul.bf16.vlgmr.msra.gmra.mxu0 %v2184_v48  ;;  %v1821_v19 = vld [vmem:[#allocation5 + $0x64] sm:$0xf]  ;;  %v1457_v20 = vld [vmem:[#allocation5 + $0x6c] sm:$0xf0]  ;;  %v1556_v27 = vor.u32 %v1845_v16, %v1553_v17  ;;  %v1393_v29 = vld [vmem:[#allocation2 + $0x30] sm:$0xf0] }
  0x3b   :  { %823 = vmatmul.bf16.vlgmr.msra.gmra.mxu1 %v2186_v53  ;;  %872 = vmatpush.bf16.msrb.mxu0 %v1496_v58  ;;  %v1893_v21 = vld [vmem:[#allocation5 + $0x2a4] sm:$0xf]  ;;  %v1745_v24 = vld [vmem:[#allocation5 + $0x2ac] sm:$0xf0]  ;;  %v1866_v30 = vld [vmem:[#allocation5 + $0x1cc] sm:$0xf]  ;;  %v1460_v35 = vor.u32 %v1821_v19, %v1457_v20 }
  0x3c   :  { %891 = vmatpush.bf16.msrb.mxu1 %v1592_v49  ;;  %842 = vmatmul.bf16.vlgmr.msra.gmra.mxu2 %v2188_v54  ;;  %v1807_v26 = vld [vmem:[#allocation2 + $0x2c] sm:$0xf0]  ;;  %v1805_v28 = vld [vmem:[#allocation2 + $0x24] sm:$0xf]  ;;  %v1637_v31 = vld [vmem:[#allocation5 + $0x1d4] sm:$0xf0]  ;;  %v1748_v39 = vor.u32 %v1893_v21, %v1745_v24 }
  0x3d   :  { %910 = vmatpush.bf16.msrb.mxu2 %v1688_v44  ;;  %861 = vmatmul.bf16.vlgmr.msra.gmra.mxu3 %v2190_v57  ;;  %v1399_v32 = vld [vmem:[#allocation2 + $0x28] sm:$0xf]  ;;  %v1842_v33 = vld [vmem:[#allocation5 + $0x10c] sm:$0xf]  ;;  %v1541_v34 = vld [vmem:[#allocation5 + $0x114] sm:$0xf0]  ;;  %v1640_v40 = vor.u32 %v1866_v30, %v1637_v31  ;;  %v2196_v44 = vor.u32 %v1807_v26, %v1391_v25  ;;  %v2198_v50 = vor.u32 %v1805_v28, %v1393_v29 }
  0x3e   :  { %929 = vmatpush.bf16.msrb.mxu3 %v1784_v59  ;;  %v1808_v36 = vld [vmem:[#allocation2 + $0x34] sm:$0xf0]  ;;  %v1806_v37 = vld [vmem:[#allocation2 + $0x2c] sm:$0xf]  ;;  %v1401_v38 = vld [vmem:[#allocation2 + $0x38] sm:$0xf0]  ;;  %v1544_v45 = vor.u32 %v1842_v33, %v1541_v34 }
  0x3f   :  { %873 = vmatpush.bf16.msrb.mxu0 %v1484_v6  ;;  %v1818_v41 = vld [vmem:[#allocation5 + $0x4c] sm:$0xf]  ;;  %v1445_v42 = vld [vmem:[#allocation5 + $0x54] sm:$0xf0]  ;;  %v1863_v47 = vld [vmem:[#allocation5 + $0x1b4] sm:$0xf]  ;;  %v2200_v51 = vor.u32 %v1808_v36, %v1399_v32  ;;  %v2202_v56 = vor.u32 %v1806_v37, %v1401_v38 }
  0x40   :  { %892 = vmatpush.bf16.msrb.mxu1 %v1580_v0  ;;  %v1890_v43 = vld [vmem:[#allocation5 + $0x28c] sm:$0xf]  ;;  %v1733_v46 = vld [vmem:[#allocation5 + $0x294] sm:$0xf0]  ;;  %v1625_v49 = vld [vmem:[#allocation5 + $0x1bc] sm:$0xf0]  ;;  %v1448_v58 = vor.u32 %v1818_v41, %v1445_v42 }
  0x41   :  { %911 = vmatpush.bf16.msrb.mxu2 %v1676_v60  ;;  %v1839_v52 = vld [vmem:[#allocation5 + $0xf4] sm:$0xf]  ;;  %v1529_v55 = vld [vmem:[#allocation5 + $0xfc] sm:$0xf0]  ;;  %v1736_v59 = vor.u32 %v1890_v43, %v1733_v46  ;;  %v1628_v60 = vor.u32 %v1863_v47, %v1625_v49  ;;  %v1860_v2 = vld [vmem:[#allocation5 + $0x19c] sm:$0xf] }
  0x42   :  { %930 = vmatpush.bf16.msrb.mxu3 %v1772_v7  ;;  %v1815_v61 = vld [vmem:[#allocation5 + $0x34] sm:$0xf]  ;;  %v1433_v62 = vld [vmem:[#allocation5 + $0x3c] sm:$0xf0]  ;;  %v1532_v0 = vor.u32 %v1839_v52, %v1529_v55  ;;  %v1613_v3 = vld [vmem:[#allocation5 + $0x1a4] sm:$0xf0] }
  0x43   :  { %874 = vmatpush.bf16.msrb.mxu0 %v1472_v18  ;;  %v1887_v63 = vld [vmem:[#allocation5 + $0x274] sm:$0xf]  ;;  %v1721_v1 = vld [vmem:[#allocation5 + $0x27c] sm:$0xf0]  ;;  %v1836_v4 = vld [vmem:[#allocation5 + $0xdc] sm:$0xf]  ;;  %v1436_v6 = vor.u32 %v1815_v61, %v1433_v62  ;;  %v1616_v9 = vor.u32 %v1860_v2, %v1613_v3 }
  0x44   :  { %893 = vmatpush.bf16.msrb.mxu1 %v1568_v12  ;;  %v1517_v5 = vld [vmem:[#allocation5 + $0xe4] sm:$0xf0]  ;;  %v1812_v7 = vld [vmem:[#allocation5 + $0x1c] sm:$0xf]  ;;  %v1857_v14 = vld [vmem:[#allocation5 + $0x184] sm:$0xf] }
  0x45   :  { %912 = vmatpush.bf16.msrb.mxu2 %v1664_v8  ;;  %v1724_v8 = vor.u32 %v1887_v63, %v1721_v1  ;;  %v1421_v10 = vld [vmem:[#allocation5 + $0x24] sm:$0xf0]  ;;  %v1884_v11 = vld [vmem:[#allocation5 + $0x25c] sm:$0xf]  ;;  %v1520_v13 = vor.u32 %v1836_v4, %v1517_v5  ;;  %v1601_v15 = vld [vmem:[#allocation5 + $0x18c] sm:$0xf0] }
  0x46   :  { %931 = vmatpush.bf16.msrb.mxu3 %v1760_v22  ;;  %v1709_v12 = vld [vmem:[#allocation5 + $0x264] sm:$0xf0]  ;;  %v1833_v16 = vld [vmem:[#allocation5 + $0xc4] sm:$0xf]  ;;  %v1505_v17 = vld [vmem:[#allocation5 + $0xcc] sm:$0xf0]  ;;  %v1424_v20 = vor.u32 %v1812_v7, %v1421_v10  ;;  %v1604_v25 = vor.u32 %v1857_v14, %v1601_v15 }
  0x47   :  { %875 = vmatpush.bf16.msrb.mxu0 %v1460_v35  ;;  %v1691_v18 = vld [vmem:[#allocation5 + $0x230] sm:$0xf]  ;;  %v1880_v19 = vld [vmem:[#allocation5 + $0x238] sm:$0xf0]  ;;  %v1809_v21 = vld [vmem:[#allocation5 + $0x4] sm:$0xf]  ;;  %v1712_v24 = vor.u32 %v1884_v11, %v1709_v12  ;;  %v1508_v29 = vor.u32 %v1833_v16, %v1505_v17 }
  0x48   :  { %894 = vmatpush.bf16.msrb.mxu1 %v1556_v27  ;;  %v1595_v22 = vld [vmem:[#allocation5 + $0x170] sm:$0xf]  ;;  %v1881_v27 = vld [vmem:[#allocation5 + $0x244] sm:$0xf]  ;;  %v1692_v30 = vor.u32 %v1880_v19, %v1691_v18  ;;  %v1832_v32 = vld [vmem:[#allocation5 + $0xb8] sm:$0xf0] }
  0x49   :  { %913 = vmatpush.bf16.msrb.mxu2 %v1652_v23  ;;  %v1856_v23 = vld [vmem:[#allocation5 + $0x178] sm:$0xf0]  ;;  %v1409_v26 = vld [vmem:[#allocation5 + $0xc] sm:$0xf0]  ;;  %v1679_v36 = vld [vmem:[#allocation5 + $0x218] sm:$0xf] }
  0x4a   :  { %932 = vmatpush.bf16.msrb.mxu3 %v1748_v39  ;;  %809 = vmatmul.bf16.gmra.mxu0 %v2196_v44  ;;  %v1697_v28 = vld [vmem:[#allocation5 + $0x24c] sm:$0xf0]  ;;  %v1596_v34 = vor.u32 %v1856_v23, %v1595_v22  ;;  %v1904_v35 = vld [vmem:[#allocation5 + $0x2f8] sm:$0xf0]  ;;  %v1877_v37 = vld [vmem:[#allocation5 + $0x220] sm:$0xf0]  ;;  %v1412_v38 = vor.u32 %v1809_v21, %v1409_v26 }
  0x4b   :  { %828 = vmatmul.bf16.gmra.mxu1 %v2198_v50  ;;  %876 = vmatpush.bf16.msrb.mxu0 %v1448_v58  ;;  %v1499_v31 = vld [vmem:[#allocation5 + $0xb0] sm:$0xf]  ;;  %v1700_v39 = vor.u32 %v1881_v27, %v1697_v28  ;;  %v1487_v41 = vld [vmem:[#allocation5 + $0x98] sm:$0xf]  ;;  %v1829_v42 = vld [vmem:[#allocation5 + $0xa0] sm:$0xf0] }
  0x4c   :  { %895 = vmatpush.bf16.msrb.mxu1 %v1544_v45  ;;  %847 = vmatmul.bf16.gmra.mxu2 %v2200_v51  ;;  %v1787_v33 = vld [vmem:[#allocation5 + $0x2f0] sm:$0xf]  ;;  %v1680_v45 = vor.u32 %v1877_v37, %v1679_v36  ;;  %v1583_v46 = vld [vmem:[#allocation5 + $0x158] sm:$0xf]  ;;  %v1853_v47 = vld [vmem:[#allocation5 + $0x160] sm:$0xf0] }
  0x4d   :  { %914 = vmatpush.bf16.msrb.mxu2 %v1640_v40  ;;  %866 = vmatmul.bf16.gmra.mxu3 %v2202_v56  ;;  %v1500_v40 = vor.u32 %v1832_v32, %v1499_v31  ;;  %v1788_v43 = vor.u32 %v1904_v35, %v1787_v33  ;;  %v1775_v49 = vld [vmem:[#allocation5 + $0x2d8] sm:$0xf]  ;;  %v1901_v52 = vld [vmem:[#allocation5 + $0x2e0] sm:$0xf0]  ;;  %v1667_v55 = vld [vmem:[#allocation5 + $0x200] sm:$0xf] }
  0x4e   :  { %933 = vmatpush.bf16.msrb.mxu3 %v1736_v59  ;;  %v1874_v58 = vld [vmem:[#allocation5 + $0x208] sm:$0xf0]  ;;  %v1488_v59 = vor.u32 %v1829_v42, %v1487_v41  ;;  %v1475_v61 = vld [vmem:[#allocation5 + $0x80] sm:$0xf]  ;;  %v1776_v63 = vor.u32 %v1901_v52, %v1775_v49  ;;  %v1655_v5 = vld [vmem:[#allocation5 + $0x1e8] sm:$0xf] }
  0x4f   :  { %877 = vmatpush.bf16.msrb.mxu0 %v1436_v6  ;;  %v1826_v62 = vld [vmem:[#allocation5 + $0x88] sm:$0xf0]  ;;  %v1571_v1 = vld [vmem:[#allocation5 + $0x140] sm:$0xf]  ;;  %v1871_v6 = vld [vmem:[#allocation5 + $0x1f0] sm:$0xf0] }
  0x50   :  { %896 = vmatpush.bf16.msrb.mxu1 %v1532_v0  ;;  %v1668_v0 = vor.u32 %v1874_v58, %v1667_v55  ;;  %v1850_v2 = vld [vmem:[#allocation5 + $0x148] sm:$0xf0]  ;;  %v1763_v3 = vld [vmem:[#allocation5 + $0x2c0] sm:$0xf]  ;;  %v1476_v7 = vor.u32 %v1826_v62, %v1475_v61  ;;  %v1823_v10 = vld [vmem:[#allocation5 + $0x70] sm:$0xf0]  ;;  %v1656_v12 = vor.u32 %v1871_v6, %v1655_v5 }
  0x51   :  { %915 = vmatpush.bf16.msrb.mxu2 %v1628_v60  ;;  %v1584_v60 = vor.u32 %v1853_v47, %v1583_v46  ;;  %v1898_v4 = vld [vmem:[#allocation5 + $0x2c8] sm:$0xf0]  ;;  %v1847_v14 = vld [vmem:[#allocation5 + $0x130] sm:$0xf0]  ;;  %v1751_v15 = vld [vmem:[#allocation5 + $0x2a8] sm:$0xf] }
  0x52   :  { %934 = vmatpush.bf16.msrb.mxu3 %v1724_v8  ;;  %v1572_v8 = vor.u32 %v1850_v2, %v1571_v1  ;;  %v1764_v11 = vor.u32 %v1898_v4, %v1763_v3  ;;  %v1895_v16 = vld [vmem:[#allocation5 + $0x2b0] sm:$0xf0]  ;;  %v1643_v17 = vld [vmem:[#allocation5 + $0x1d0] sm:$0xf]  ;;  %v1868_v18 = vld [vmem:[#allocation5 + $0x1d8] sm:$0xf0] }
  0x53   :  { %878 = vmatpush.bf16.msrb.mxu0 %v1424_v20  ;;  %v1451_v21 = vld [vmem:[#allocation5 + $0x50] sm:$0xf]  ;;  %v1820_v22 = vld [vmem:[#allocation5 + $0x58] sm:$0xf0]  ;;  %v1752_v23 = vor.u32 %v1895_v16, %v1751_v15  ;;  %v1439_v33 = vld [vmem:[#allocation5 + $0x38] sm:$0xf] }
  0x54   :  { %897 = vmatpush.bf16.msrb.mxu1 %v1520_v13  ;;  %v1559_v13 = vld [vmem:[#allocation5 + $0x128] sm:$0xf]  ;;  %v1844_v26 = vld [vmem:[#allocation5 + $0x118] sm:$0xf0]  ;;  %v1739_v27 = vld [vmem:[#allocation5 + $0x290] sm:$0xf]  ;;  %v1452_v31 = vor.u32 %v1820_v22, %v1451_v21 }
  0x55   :  { %916 = vmatpush.bf16.msrb.mxu2 %v1616_v9  ;;  %v1463_v9 = vld [vmem:[#allocation5 + $0x68] sm:$0xf]  ;;  %v1560_v20 = vor.u32 %v1847_v14, %v1559_v13  ;;  %v1892_v28 = vld [vmem:[#allocation5 + $0x298] sm:$0xf0]  ;;  %v1535_v37 = vld [vmem:[#allocation5 + $0xf8] sm:$0xf] }
  0x56   :  { %935 = vmatpush.bf16.msrb.mxu3 %v1712_v24  ;;  %v1464_v19 = vor.u32 %v1823_v10, %v1463_v9  ;;  %v1644_v24 = vor.u32 %v1868_v18, %v1643_v17  ;;  %v1740_v35 = vor.u32 %v1892_v28, %v1739_v27  ;;  %v1619_v41 = vld [vmem:[#allocation5 + $0x1a0] sm:$0xf]  ;;  %v1862_v42 = vld [vmem:[#allocation5 + $0x1a8] sm:$0xf0]  ;;  %v1607_v61 = vld [vmem:[#allocation5 + $0x188] sm:$0xf] }
  0x57   :  { %879 = vmatpush.bf16.msrb.mxu0 %v1412_v38  ;;  %v1841_v38 = vld [vmem:[#allocation5 + $0x100] sm:$0xf0]  ;;  %v1427_v46 = vld [vmem:[#allocation5 + $0x20] sm:$0xf]  ;;  %v1814_v47 = vld [vmem:[#allocation5 + $0x28] sm:$0xf0]  ;;  %v1620_v52 = vor.u32 %v1862_v42, %v1619_v41 }
  0x58   :  { %898 = vmatpush.bf16.msrb.mxu1 %v1508_v29  ;;  %v1631_v29 = vld [vmem:[#allocation5 + $0x1b8] sm:$0xf]  ;;  %v1523_v55 = vld [vmem:[#allocation5 + $0xe0] sm:$0xf]  ;;  %v1838_v58 = vld [vmem:[#allocation5 + $0xe8] sm:$0xf0] }
  0x59   :  { %917 = vmatpush.bf16.msrb.mxu2 %v1604_v25  ;;  %v1547_v25 = vld [vmem:[#allocation5 + $0x110] sm:$0xf]  ;;  %v1859_v62 = vld [vmem:[#allocation5 + $0x190] sm:$0xf0]  ;;  %v1415_v1 = vld [vmem:[#allocation5 + $0x8] sm:$0xf] }
  0x5a   :  { %936 = vmatpush.bf16.msrb.mxu3 %v1700_v39  ;;  %880 = vmatmul.bf16.vlgmr.msrb.gmra.mxu0 %v2184_v48  ;;  %v1548_v32 = vor.u32 %v1844_v26, %v1547_v25  ;;  %v1727_v39 = vld [vmem:[#allocation5 + $0x278] sm:$0xf]  ;;  %v1608_v3 = vor.u32 %v1859_v62, %v1607_v61  ;;  %v1811_v4 = vld [vmem:[#allocation5 + $0x10] sm:$0xf0]  ;;  %v1511_v5 = vld [vmem:[#allocation5 + $0xc8] sm:$0xf] }
  0x5b   :  { %948 = vmatpush.bf16.msra.mxu0 %v1500_v40  ;;  %899 = vmatmul.bf16.vlgmr.msrb.gmra.mxu1 %v2186_v53  ;;  %v1889_v40 = vld [vmem:[#allocation5 + $0x280] sm:$0xf0]  ;;  %v1835_v6 = vld [vmem:[#allocation5 + $0xd0] sm:$0xf0]  ;;  %v1416_v9 = vor.u32 %v1811_v4, %v1415_v1  ;;  %v1243_v26 = vld [vmem:[#allocation10 + $0x78] sm:$0xff]  ;;  %vm1286_vm4 = vcmask 1041409  }
  0x5c   :  { %967 = vmatpush.bf16.msra.mxu1 %v1596_v34  ;;  %918 = vmatmul.bf16.vlgmr.msrb.gmra.mxu2 %v2188_v54  ;;  %v1817_v34 = vld [vmem:[#allocation5 + $0x40] sm:$0xf0]  ;;  %v1728_v49 = vor.u32 %v1889_v40, %v1727_v39  ;;  %v1512_v10 = vor.u32 %v1835_v6, %v1511_v5  ;;  %v1239_v42 = vld [vmem:[#allocation10 + $0x58] sm:$0xff]  ;;  %s2133_s27 = smov [#allocation11]   ;;  %s1361_s7 = sshll.u32 %s2340_s6, 4  ;;  %s1362_s7 = int_to_ptr.hbm [resolvable:$true] %s1361_s7 }
  0x5d   :  { %986 = vmatpush.bf16.msra.mxu2 %v1692_v30  ;;  %937 = vmatmul.bf16.vlgmr.msrb.gmra.mxu3 %v2190_v57  ;;  %v1865_v30 = vld [vmem:[#allocation5 + $0x1c0] sm:$0xf0]  ;;  %v1235_v5 = vld [vmem:[#allocation10 + $0x38] sm:$0xff]  ;;  %s1359_s28 = sshll.u32 %s2133_s27, 4  ;;  %s1360_s28 = int_to_ptr.vmem [resolvable:$true] %s1359_s28 }
  0x5e   :  { %1005 = vmatpush.bf16.msra.mxu3 %v1788_v43  ;;  %v1632_v36 = vor.u32 %v1865_v30, %v1631_v29  ;;  %v1440_v43 = vor.u32 %v1817_v34, %v1439_v33  ;;  %v1242_v28 = vld [vmem:[#allocation10 + $0x70] sm:$0xff] }
  0x5f   :  { %949 = vmatpush.bf16.msra.mxu0 %v1488_v59  ;;  %v1715_v59 = vld [vmem:[#allocation5 + $0x260] sm:$0xf] }
  0x60   :  { %968 = vmatpush.bf16.msra.mxu1 %v1584_v60  ;;  %v1886_v60 = vld [vmem:[#allocation5 + $0x268] sm:$0xf0] }
  0x61   :  { %987 = vmatpush.bf16.msra.mxu2 %v1680_v45  ;;  %v1536_v45 = vor.u32 %v1841_v38, %v1535_v37  ;;  %v1716_v2 = vor.u32 %v1886_v60, %v1715_v59 }
  0x62   :  { %1006 = vmatpush.bf16.msra.mxu3 %v1776_v63  ;;  %v1428_v63 = vor.u32 %v1814_v47, %v1427_v46  ;;  %v1238_v46 = vld [vmem:[#allocation10 + $0x50] sm:$0xff] }
  0x63   :  { %950 = vmatpush.bf16.msra.mxu0 %v1476_v7  ;;  %v1703_v7 = vld [vmem:[#allocation5 + $0x248] sm:$0xf] }
  0x64   :  { %969 = vmatpush.bf16.msra.mxu1 %v1572_v8  ;;  %v1883_v8 = vld [vmem:[#allocation5 + $0x250] sm:$0xf0] }
  0x65   :  { %988 = vmatpush.bf16.msra.mxu2 %v1668_v0  ;;  %v1524_v0 = vor.u32 %v1838_v58, %v1523_v55 }
  0x66   :  { %1007 = vmatpush.bf16.msra.mxu3 %v1764_v11  ;;  %v1704_v11 = vor.u32 %v1883_v8, %v1703_v7 }
  0x67   :  { %951 = vmatpush.bf16.msra.mxu0 %v1464_v19 }
  0x68   :  { %970 = vmatpush.bf16.msra.mxu1 %v1560_v20 }
  0x69   :  { %989 = vmatpush.bf16.msra.mxu2 %v1656_v12  ;;  %v2224_v12 = vld [vmem:[#allocation7] sm:$0x7] }
  0x6a   :  { %1008 = vmatpush.bf16.msra.mxu3 %v1752_v23  ;;  %885 = vmatmul.bf16.gmra.mxu0 %v2196_v44  ;;  %v238_v13 = vperm.slane %v2224_v12, 0  ;;  %v2237_v60 = vperm.slane %v2224_v12, 1 }
  0x6b   :  { %952 = vmatpush.bf16.msra.mxu0 %v1452_v31  ;;  %904 = vmatmul.bf16.gmra.mxu1 %v2198_v50  ;;  %v1241_v31 = vld [vmem:[#allocation10 + $0x68] sm:$0xff] }
  0x6c   :  { %971 = vmatpush.bf16.msra.mxu1 %v1548_v32  ;;  %923 = vmatmul.bf16.gmra.mxu2 %v2200_v51 }
  0x6d   :  { %990 = vmatpush.bf16.msra.mxu2 %v1644_v24  ;;  %942 = vmatmul.bf16.gmra.mxu3 %v2202_v56 }
  0x6e   :  { %1009 = vmatpush.bf16.msra.mxu3 %v1740_v35 }
  0x6f   :  { %953 = vmatpush.bf16.msra.mxu0 %v1440_v43 }
  0x70   :  { %972 = vmatpush.bf16.msra.mxu1 %v1536_v45 }
  0x71   :  { %991 = vmatpush.bf16.msra.mxu2 %v1632_v36  ;;  %v1240_v36 = vld [vmem:[#allocation10 + $0x60] sm:$0xff] }
  0x72   :  { %1010 = vmatpush.bf16.msra.mxu3 %v1728_v49 }
  0x73   :  { %954 = vmatpush.bf16.msra.mxu0 %v1428_v63  ;;  %v1236_v63 = vld [vmem:[#allocation10 + $0x40] sm:$0xff] }
  0x74   :  { %973 = vmatpush.bf16.msra.mxu1 %v1524_v0 }
  0x75   :  { %992 = vmatpush.bf16.msra.mxu2 %v1620_v52  ;;  %v1237_v52 = vld [vmem:[#allocation10 + $0x48] sm:$0xff] }
  0x76   :  { %1011 = vmatpush.bf16.msra.mxu3 %v1716_v2 }
  0x77   :  { %955 = vmatpush.bf16.msra.mxu0 %v1416_v9  ;;  %v1234_v9 = vld [vmem:[#allocation10 + $0x30] sm:$0xff] }
  0x78   :  { %974 = vmatpush.bf16.msra.mxu1 %v1512_v10 }
  0x79   :  { %993 = vmatpush.bf16.msra.mxu2 %v1608_v3 }
  0x7a   :  { %1012 = vmatpush.bf16.msra.mxu3 %v1704_v11  ;;  %956 = vmatmul.bf16.vlgmr.msra.gmra.mxu0 %v2184_v48 }
  0x7b   :  { %975 = vmatmul.bf16.vlgmr.msra.gmra.mxu1 %v2186_v53  ;;  %1293 = vmatpush.msrb.mxu0 %v1243_v26 }
  0x7c   :  { %994 = vmatmul.bf16.vlgmr.msra.gmra.mxu2 %v2188_v54 }
  0x7d   :  { %1013 = vmatmul.bf16.vlgmr.msra.gmra.mxu3 %v2190_v57  ;;  %1294 = vmatpush.msrb.mxu0 %v1242_v28 }
  0x7f   :  { %1295 = vmatpush.msrb.mxu0 %v1241_v31  ;;  %v2250_v31 = vld [vmem:[#allocation8 + $0x18] sm:$0xff] }
  0x81   :  { %1296 = vmatpush.msrb.mxu0 %v1240_v36 }
  0x83   :  { %1297 = vmatpush.msrb.mxu0 %v1239_v42 }
  0x85   :  { %1298 = vmatpush.msrb.mxu0 %v1238_v46 }
  0x87   :  { %1299 = vmatpush.msrb.mxu0 %v1237_v52 }
  0x89   :  { %1300 = vmatpush.msrb.mxu0 %v1236_v63 }
  0x8a   :  { %961 = vmatmul.bf16.gmra.mxu0 %v2196_v44 }
  0x8b   :  { %980 = vmatmul.bf16.gmra.mxu1 %v2198_v50  ;;  %1301 = vmatpush.msrb.mxu0 %v1235_v5 }
  0x8c   :  { %999 = vmatmul.bf16.gmra.mxu2 %v2200_v51 }
  0x8d   :  { %1018 = vmatmul.bf16.gmra.mxu3 %v2202_v56  ;;  %1302 = vmatpush.msrb.mxu0 %v1234_v9 }
  0xb7   :  { %v805_v14 = vpop.f32.mrf.mxu0 }
  0xb8   :  { %v806_v48 = vadd.f32 %v805_v14, %v238_v13  ;;  %v824_v15 = vpop.f32.mrf.mxu1  ;;  %v1233_v14 = vld [vmem:[#allocation10 + $0x28] sm:$0xff] }
  0xb9   :  { %1303 = vmatpush.msrb.mxu0 %v1233_v14 }
  0xba   :  { %v825_v53 = vadd.f32 %v824_v15, %v806_v48 }
  0xbf   :  { %v843_v16 = vpop.f32.mrf.mxu2  ;;  %v807_v57 = vpop.f32.mrf.mxu0 }
  0xc0   :  { %v844_v54 = vadd.f32 %v843_v16, %v825_v53  ;;  %v862_v17 = vpop.f32.mrf.mxu3  ;;  %v826_v18 = vpop.f32.mrf.mxu1  ;;  %v808_v50 = vadd.f32 %v807_v57, %v238_v13 }
  0xc2   :  { %v2227_v44 = vadd.f32 %v862_v17, %v844_v54  ;;  %v827_v56 = vadd.f32 %v826_v18, %v808_v50  ;;  %v1232_v17 = vld [vmem:[#allocation10 + $0x20] sm:$0xff] }
  0xc3   :  { %1304 = vmatpush.msrb.mxu0 %v1232_v17 }
  0xc4   :  { %v1024_v51 = vmin.f32 %v2227_v44, 20.0  ;;  %vm1084_vm0 = vcmp.gt.f32.partialorder %v2227_v44, 20.0 }
  0xc6   :  { %v1036_v19 = vmul.f32 1.442695, %v1024_v51 }
  0xc7   :  { %v845_v20 = vpop.f32.mrf.mxu2  ;;  %v810_v23 = vpop.f32.mrf.mxu0 }
  0xc8   :  { %1920 = vpow2.f32 %v1036_v19  ;;  %v846_v21 = vadd.f32 %v845_v20, %v827_v56  ;;  %v864_v22 = vpop.f32.mrf.mxu3  ;;  %v811_v24 = vadd.f32 %v810_v23, %v238_v13  ;;  %v829_v25 = vpop.f32.mrf.mxu1 }
  0xca   :  { %v2230_v27 = vadd.f32 %v864_v22, %v846_v21  ;;  %v830_v30 = vadd.f32 %v829_v25, %v811_v24  ;;  %v1231_v21 = vld [vmem:[#allocation10 + $0x18] sm:$0xff] }
  0xcb   :  { %1305 = vmatpush.msrb.mxu0 %v1231_v21 }
  0xcc   :  { %v1027_v29 = vmin.f32 %v2230_v27, 20.0  ;;  %vm1087_vm1 = vcmp.gt.f32.partialorder %v2230_v27, 20.0 }
  0xce   :  { %v1921_v32 = vpop.eup %1920  ;;  %v1042_v33 = vmul.f32 1.442695, %v1027_v29  ;;  %v1230_v29 = vld [vmem:[#allocation10 + $0x10] sm:$0xff] }
  0xcf   :  { %v1060_v34 = vadd.f32 1.0, %v1921_v32  ;;  %v848_v35 = vpop.f32.mrf.mxu2  ;;  %v812_v39 = vpop.f32.mrf.mxu0  ;;  %1306 = vmatpush.msrb.mxu0 %v1230_v29 }
  0xd0   :  { %1922 = vpow2.f32 %v1042_v33  ;;  %v849_v37 = vadd.f32 %v848_v35, %v830_v30  ;;  %v867_v38 = vpop.f32.mrf.mxu3  ;;  %v831_v41 = vpop.f32.mrf.mxu1  ;;  %v813_v45 = vadd.f32 %v812_v39, %v238_v13  ;;  %v1229_v33 = vld [vmem:[#allocation10 + $0x8] sm:$0xff] }
  0xd1   :  { %v1072_v40 = vmul.f32 %v1060_v34, %v1060_v34  ;;  %1307 = vmatpush.msrb.mxu0 %v1229_v33 }
  0xd2   :  { %v2233_v43 = vadd.f32 %v867_v38, %v849_v37  ;;  %v832_v59 = vadd.f32 %v831_v41, %v813_v45  ;;  %v2255_v37 = vld [vmem:[#allocation8] sm:$0xff]  ;;  %v1228_v41 = vld [vmem:[#allocation10] sm:$0xff] }
  0xd3   :  { %v1120_v49 = vadd.f32 1.0, %v1072_v40  ;;  %v1789_v10 = vadd.f32 -1.0, %v1072_v40  ;;  %1308 = vmatpush.msrb.mxu0 %v1228_v41 }
  0xd4   :  { %v1030_v47 = vmin.f32 %v2233_v43, 20.0  ;;  %vm1090_vm2 = vcmp.gt.f32.partialorder %v2233_v43, 20.0 }
  0xd5   :  { %v1108_v57 = vmul.f32 %v1789_v10, %v2227_v44 }
  0xd6   :  { %v1923_v55 = vpop.eup %1922  ;;  %v1048_v58 = vmul.f32 1.442695, %v1030_v47 }
  0xd7   :  { %v1063_v61 = vadd.f32 1.0, %v1923_v55  ;;  %v850_v62 = vpop.f32.mrf.mxu2  ;;  %v881_v3 = vpop.f32.mrf.mxu0 }
  0xd8   :  { %1924 = vpow2.f32 %v1048_v58  ;;  %v851_v0 = vadd.f32 %v850_v62, %v832_v59  ;;  %v869_v1 = vpop.f32.mrf.mxu3  ;;  %v900_v4 = vpop.f32.mrf.mxu1  ;;  %v882_v7 = vadd.f32 %v881_v3, %v2237_v60  ;;  %v1259_v59 = vld [vmem:[#allocation10 + $0xf8] sm:$0xff] }
  0xd9   :  { %1926 = vrcp.f32 %v1120_v49  ;;  %v1075_v2 = vmul.f32 %v1063_v61, %v1063_v61  ;;  %1313 = vmatpush.msrb.mxu1 %v1259_v59  ;;  %v1249_v59 = vld [vmem:[#allocation10 + $0xa8] sm:$0xff] }
  0xda   :  { %v2239_v6 = vadd.f32 %v869_v1, %v851_v0  ;;  %v901_v13 = vadd.f32 %v900_v4, %v882_v7  ;;  %v1258_v0 = vld [vmem:[#allocation10 + $0xf0] sm:$0xff]  ;;  %v1257_v7 = vld [vmem:[#allocation10 + $0xe8] sm:$0xff] }
  0xdb   :  { %v1123_v8 = vadd.f32 1.0, %v1075_v2  ;;  %v1792_v15 = vadd.f32 -1.0, %v1075_v2  ;;  %1314 = vmatpush.msrb.mxu1 %v1258_v0 }
  0xdc   :  { %v1033_v11 = vmin.f32 %v2239_v6, 20.0  ;;  %vm1093_vm3 = vcmp.gt.f32.partialorder %v2239_v6, 20.0 }
  0xdd   :  { %1928 = vrcp.f32 %v1123_v8  ;;  %v1111_v23 = vmul.f32 %v1792_v15, %v2230_v27  ;;  %1315 = vmatpush.msrb.mxu1 %v1257_v7  ;;  %v1256_v15 = vld [vmem:[#allocation10 + $0xe0] sm:$0xff] }
  0xde   :  { %v1925_v48 = vpop.eup %1924  ;;  %v1054_v53 = vmul.f32 1.442695, %v1033_v11  ;;  %v1248_v7 = vld [vmem:[#allocation10 + $0xa0] sm:$0xff] }
  0xdf   :  { %v1927_v16 = vpop.eup %1926  ;;  %v1066_v54 = vadd.f32 1.0, %v1925_v48  ;;  %v919_v18 = vpop.f32.mrf.mxu2  ;;  %1316 = vmatpush.msrb.mxu1 %v1256_v15  ;;  %v1247_v15 = vld [vmem:[#allocation10 + $0x98] sm:$0xff] }
  0xe0   :  { %1930 = vpow2.f32 %v1054_v53  ;;  %v938_v50 = vpop.f32.mrf.mxu3  ;;  %v920_v19 = vadd.f32 %v919_v18, %v901_v13  ;;  %v883_v56 = vpop.f32.mrf.mxu0  ;;  %v1144_v22 = vmul.f32 %v1927_v16, %v1108_v57  ;;  %v1255_v57 = vld [vmem:[#allocation10 + $0xd8] sm:$0xff] }
  0xe1   :  { %v1078_v51 = vmul.f32 %v1066_v54, %v1066_v54  ;;  %v902_v20 = vpop.f32.mrf.mxu1  ;;  %v884_v28 = vadd.f32 %v883_v56, %v2237_v60  ;;  %1317 = vmatpush.msrb.mxu1 %v1255_v57 }
  0xe2   :  { %v2245_v26 = vadd.f32 %v938_v50, %v920_v19  ;;  %v1156_v35 = vsel %vm1084_vm0, %v2227_v44, %v1144_v22  ;;  %v1254_v22 = vld [vmem:[#allocation10 + $0xd0] sm:$0xff] }
  0xe3   :  { %v1929_v24 = vpop.eup %1928  ;;  %v1126_v25 = vadd.f32 1.0, %v1078_v51  ;;  %v903_v40 = vadd.f32 %v902_v20, %v884_v28  ;;  %v1795_v55 = vadd.f32 -1.0, %v1078_v51  ;;  %1318 = vmatpush.msrb.mxu1 %v1254_v22  ;;  %v1253_v28 = vld [vmem:[#allocation10 + $0xc8] sm:$0xff] }
  0xe4   :  { %v1147_v30 = vmul.f32 %v1929_v24, %v1111_v23  ;;  %v1025_v32 = vmin.f32 %v2245_v26, 20.0  ;;  %vm1085_vm6 = vcmp.gt.f32.partialorder %v2245_v26, 20.0 }
  0xe5   :  { %1932 = vrcp.f32 %v1126_v25  ;;  %v1114_v4 = vmul.f32 %v1795_v55, %v2233_v43  ;;  %v2274_v25 = vperm.slane %v2224_v12, 2  ;;  %1319 = vmatpush.msrb.mxu1 %v1253_v28 }
  0xe6   :  { %v1931_v34 = vpop.eup %1930  ;;  %v1159_v36 = vsel %vm1087_vm1, %v2230_v27, %v1147_v30  ;;  %v1038_v39 = vmul.f32 1.442695, %v1025_v32  ;;  %v1174_v27 = vadd.f32 %v2255_v37, %v1156_v35 }
  0xe7   :  { %v1069_v38 = vadd.f32 1.0, %v1931_v34  ;;  %v1177_v42 = vadd.f32 %v2250_v31, %v1159_v36  ;;  %v921_v45 = vpop.f32.mrf.mxu2 }
  0xe8   :  { %v940_v46 = vpop.f32.mrf.mxu3  ;;  %1934 = vpow2.f32 %v1038_v39  ;;  %v922_v49 = vadd.f32 %v921_v45, %v903_v40  ;;  %v886_v52 = vpop.f32.mrf.mxu0  ;;  %v1252_v39 = vld [vmem:[#allocation10 + $0xc0] sm:$0xff]  ;;  %v1251_v45 = vld [vmem:[#allocation10 + $0xb8] sm:$0xff] }
  0xe9   :  { %v1081_v47 = vmul.f32 %v1069_v38, %v1069_v38  ;;  %v905_v44 = vpop.f32.mrf.mxu1  ;;  %v887_v58 = vadd.f32 %v886_v52, %v2237_v60  ;;  %v1186_v63 = vmax.f32 %v1174_v27, %v1177_v42  ;;  %1320 = vmatpush.msrb.mxu1 %v1252_v39  ;;  %v1250_v52 = vld [vmem:[#allocation10 + $0xb0] sm:$0xff] }
  0xea   :  { %v2260_v62 = vadd.f32 %v940_v46, %v922_v49 }
  0xeb   :  { %v1129_v61 = vadd.f32 1.0, %v1081_v47  ;;  %v1933_v1 = vpop.eup %1932  ;;  %v906_v3 = vadd.f32 %v905_v44, %v887_v58  ;;  %v1798_v5 = vadd.f32 -1.0, %v1081_v47  ;;  %v1187_v10 = vrot.slane %v1186_v63, 4  ;;  %1321 = vmatpush.msrb.mxu1 %v1251_v45 }
  0xec   :  { %v1028_v2 = vmin.f32 %v2260_v62, 20.0  ;;  %v1150_v11 = vmul.f32 %v1933_v1, %v1114_v4  ;;  %vm1088_vm5 = vcmp.gt.f32.partialorder %v2260_v62, 20.0 }
  0xed   :  { %1936 = vrcp.f32 %v1129_v61  ;;  %v1117_v17 = vmul.f32 %v1798_v5, %v2239_v6  ;;  %v1188_v21 = vmax.f32 %v1186_v63, %v1187_v10  ;;  %1322 = vmatpush.msrb.mxu1 %v1250_v52 }
  0xee   :  { %v1935_v8 = vpop.eup %1934  ;;  %v1044_v9 = vmul.f32 1.442695, %v1028_v2  ;;  %v1162_v19 = vsel %vm1090_vm2, %v2233_v43, %v1150_v11 }
  0xef   :  { %v1061_v13 = vadd.f32 1.0, %v1935_v8  ;;  %v924_v14 = vpop.f32.mrf.mxu2  ;;  %v1189_v38 = vrot.slane %v1188_v21, 2  ;;  %1323 = vmatpush.msrb.mxu1 %v1249_v59 }
  0xf0   :  { %v943_v48 = vpop.f32.mrf.mxu3  ;;  %1938 = vpow2.f32 %v1044_v9  ;;  %v925_v53 = vadd.f32 %v924_v14, %v906_v3  ;;  %v888_v16 = vpop.f32.mrf.mxu0 }
  0xf1   :  { %v907_v54 = vpop.f32.mrf.mxu1  ;;  %v889_v51 = vadd.f32 %v888_v16, %v2237_v60  ;;  %v1073_v20 = vmul.f32 %v1061_v13, %v1061_v13  ;;  %v1180_v60 = vadd.f32 %v2255_v37, %v1162_v19  ;;  %v1190_v49 = vmax.f32 %v1188_v21, %v1189_v38  ;;  %1324 = vmatpush.msrb.mxu1 %v1248_v7  ;;  %v1246_v19 = vld [vmem:[#allocation10 + $0x90] sm:$0xff]  ;;  %v1169_v38 = vld [vmem:[#allocation8 + $0x8] sm:$0xff] }
  0xf2   :  { %v2266_v50 = vadd.f32 %v943_v48, %v925_v53 }
  0xf3   :  { %v1937_v18 = vpop.eup %1936  ;;  %v908_v32 = vadd.f32 %v907_v54, %v889_v51  ;;  %v1121_v33 = vadd.f32 1.0, %v1073_v20  ;;  %v1790_v58 = vadd.f32 -1.0, %v1073_v20  ;;  %v1191_v5 = vrot.slane %v1190_v49, 1  ;;  %1325 = vmatpush.msrb.mxu1 %v1247_v15  ;;  %v1270_v15 = vld [vmem:[#allocation10 + $0x150] sm:$0xff] }
  0xf4   :  { %v1153_v56 = vmul.f32 %v1937_v18, %v1117_v17  ;;  %v1031_v23 = vmin.f32 %v2266_v50, 20.0  ;;  %vm1091_vm7 = vcmp.gt.f32.partialorder %v2266_v50, 20.0 }
  0xf5   :  { %v1109_v13 = vmul.f32 %v1790_v58, %v2245_v26  ;;  %v1192_v51 = vmax.f32 %v1190_v49, %v1191_v5  ;;  %1326 = vmatpush.msrb.mxu1 %v1246_v19  ;;  %v1274_v49 = vld [vmem:[#allocation10 + $0x170] sm:$0xff] }
  0xf6   :  { %v1165_v24 = vsel %vm1093_vm3, %v2239_v6, %v1153_v56  ;;  %v1939_v29 = vpop.eup %1938  ;;  %v1050_v30 = vmul.f32 1.442695, %v1031_v23  ;;  %v1245_v23 = vld [vmem:[#allocation10 + $0x88] sm:$0xff] }
  0xf7   :  { %v1183_v43 = vadd.f32 %v2250_v31, %v1165_v24  ;;  %v1064_v34 = vadd.f32 1.0, %v1939_v29  ;;  %v926_v35 = vpop.f32.mrf.mxu2  ;;  %v2290_v29 = vld [vmem:[#allocation8 + $0x20] sm:$0xff]  ;;  %1327 = vmatpush.msrb.mxu1 %v1245_v23 }
  0xf8   :  { %v945_v36 = vpop.f32.mrf.mxu3  ;;  %1940 = vpow2.f32 %v1050_v30  ;;  %v927_v6 = vadd.f32 %v926_v35, %v908_v32  ;;  %v957_v12 = vpop.f32.mrf.mxu0  ;;  %v1244_v35 = vld [vmem:[#allocation10 + $0x80] sm:$0xff] }
  0xf9   :  { %v1207_v40 = vmax.f32 %v1180_v60, %v1183_v43  ;;  %v976_v41 = vpop.f32.mrf.mxu1  ;;  %v1076_v42 = vmul.f32 %v1064_v34, %v1064_v34  ;;  %v958_v37 = vadd.f32 %v957_v12, %v2274_v25  ;;  %1942 = vrcp.f32 %v1121_v33  ;;  %1328 = vmatpush.msrb.mxu1 %v1244_v35 }
  0xfa   :  { %v2279_v46 = vadd.f32 %v945_v36, %v927_v6 }
  0xfb   :  { %v1208_v31 = vrot.slane %v1207_v40, 4  ;;  %v1124_v47 = vadd.f32 1.0, %v1076_v42  ;;  %v977_v27 = vadd.f32 %v976_v41, %v958_v37  ;;  %v1793_v63 = vadd.f32 -1.0, %v1076_v42  ;;  %v1275_v41 = vld [vmem:[#allocation10 + $0x178] sm:$0xff] }
  0xfc   :  { %v1034_v44 = vmin.f32 %v2279_v46, 20.0  ;;  %1333 = vmatpush.msrb.mxu2 %v1275_v41  ;;  %vm1094_vm8 = vcmp.gt.f32.partialorder %v2279_v46, 20.0 }
  0xfd   :  { %v1209_v55 = vmax.f32 %v1207_v40, %v1208_v31  ;;  %1944 = vrcp.f32 %v1124_v47  ;;  %v1112_v53 = vmul.f32 %v1793_v63, %v2260_v62 }
  0xfe   :  { %v1941_v61 = vpop.eup %1940  ;;  %v1056_v0 = vmul.f32 1.442695, %v1034_v44  ;;  %1334 = vmatpush.msrb.mxu2 %v1274_v49  ;;  %v1263_v49 = vld [vmem:[#allocation10 + $0x118] sm:$0xff] }
  0xff   :  { %v1210_v1 = vrot.slane %v1209_v55, 2  ;;  %v1067_v2 = vadd.f32 1.0, %v1941_v61  ;;  %v995_v3 = vpop.f32.mrf.mxu2  ;;  %v1943_v11 = vpop.eup %1942 }
 0x100   :  { %v1014_v4 = vpop.f32.mrf.mxu3  ;;  %1946 = vpow2.f32 %v1056_v0  ;;  %v996_v8 = vadd.f32 %v995_v3, %v977_v27  ;;  %v959_v9 = vpop.f32.mrf.mxu0  ;;  %v1145_v56 = vmul.f32 %v1943_v11, %v1109_v13  ;;  %v1272_v3 = vld [vmem:[#allocation10 + $0x160] sm:$0xff] }
 0x101   :  { %v1211_v10 = vmax.f32 %v1209_v55, %v1210_v1  ;;  %v1079_v14 = vmul.f32 %v1067_v2, %v1067_v2  ;;  %v978_v48 = vpop.f32.mrf.mxu1  ;;  %v960_v54 = vadd.f32 %v959_v9, %v2274_v25  ;;  %v1273_v55 = vld [vmem:[#allocation10 + $0x168] sm:$0xff]  ;;  %v1271_v9 = vld [vmem:[#allocation10 + $0x158] sm:$0xff] }
 0x102   :  { %v2284_v16 = vadd.f32 %v1014_v4, %v996_v8  ;;  %v1157_v36 = vsel %vm1085_vm6, %v2245_v26, %v1145_v56  ;;  %1335 = vmatpush.msrb.mxu2 %v1273_v55  ;;  %v1262_v55 = vld [vmem:[#allocation10 + $0x110] sm:$0xff] }
 0x103   :  { %v1212_v17 = vrot.slane %v1211_v10, 1  ;;  %v1945_v57 = vpop.eup %1944  ;;  %v1127_v18 = vadd.f32 1.0, %v1079_v14  ;;  %v979_v43 = vadd.f32 %v978_v48, %v960_v54  ;;  %v1796_v42 = vadd.f32 -1.0, %v1079_v14 }
 0x104   :  { %v1148_v20 = vmul.f32 %v1945_v57, %v1112_v53  ;;  %v1026_v21 = vmin.f32 %v2284_v16, 20.0  ;;  %v1175_v45 = vadd.f32 %v1169_v38, %v1157_v36  ;;  %1336 = vmatpush.msrb.mxu2 %v1272_v3  ;;  %vm1086_vm10 = vcmp.gt.f32.partialorder %v2284_v16, 20.0 }
 0x105   :  { %v1213_v22 = vmax.f32 %v1211_v10, %v1212_v17  ;;  %1948 = vrcp.f32 %v1127_v18  ;;  %v1115_v59 = vmul.f32 %v1796_v42, %v2266_v50 }
 0x106   :  { %v1947_v24 = vpop.eup %1946  ;;  %v1160_v28 = vsel %vm1088_vm5, %v2260_v62, %v1148_v20  ;;  %v1040_v60 = vmul.f32 1.442695, %v1026_v21  ;;  %1337 = vmatpush.msrb.mxu2 %v1271_v9 }
 0x107   :  { %v1287_v30 = vsel %vm1286_vm4, %v1213_v22, %v1192_v51  ;;  %v1070_v32 = vadd.f32 1.0, %v1947_v24  ;;  %v997_v33 = vpop.f32.mrf.mxu2  ;;  %v1178_v40 = vadd.f32 %v2290_v29, %v1160_v28  ;;  %v1269_v51 = vld [vmem:[#allocation10 + $0x148] sm:$0xff]  ;;  %v1268_v28 = vld [vmem:[#allocation10 + $0x140] sm:$0xff] }
 0x108   :  { %v1016_v34 = vpop.f32.mrf.mxu3  ;;  %1309 = vmatmul.f32.vlgmr.msrb.gmra.mxu0 %v1287_v30  ;;  %1950 = vpow2.f32 %v1040_v60  ;;  %v998_v62 = vadd.f32 %v997_v33, %v979_v43  ;;  %v962_v39 = vpop.f32.mrf.mxu0  ;;  %1338 = vmatpush.msrb.mxu2 %v1270_v15  ;;  %v1170_v15 = vld [vmem:[#allocation8 + $0x10] sm:$0xff] }
 0x109   :  { %v1082_v6 = vmul.f32 %v1070_v32, %v1070_v32  ;;  %v963_v12 = vadd.f32 %v962_v39, %v2274_v25  ;;  %v981_v47 = vpop.f32.mrf.mxu1  ;;  %v1193_v27 = vmax.f32 %v1175_v45, %v1178_v40 }
 0x10a   :  { %v2297_v37 = vadd.f32 %v1016_v34, %v998_v62  ;;  %1339 = vmatpush.msrb.mxu2 %v1269_v51  ;;  %v1267_v34 = vld [vmem:[#allocation10 + $0x138] sm:$0xff] }
 0x10b   :  { %v1130_v31 = vadd.f32 1.0, %v1082_v6  ;;  %v982_v52 = vadd.f32 %v981_v47, %v963_v12  ;;  %v1949_v44 = vpop.eup %1948  ;;  %v1799_v61 = vadd.f32 -1.0, %v1082_v6  ;;  %v1194_v8 = vrot.slane %v1193_v27, 4  ;;  %v1264_v6 = vld [vmem:[#allocation10 + $0x120] sm:$0xff] }
 0x10c   :  { %v1029_v26 = vmin.f32 %v2297_v37, 20.0  ;;  %v1151_v4 = vmul.f32 %v1949_v44, %v1115_v59  ;;  %1340 = vmatpush.msrb.mxu2 %v1268_v28  ;;  %vm1089_vm9 = vcmp.gt.f32.partialorder %v2297_v37, 20.0 }
 0x10d   :  { %1952 = vrcp.f32 %v1130_v31  ;;  %v1118_v10 = vmul.f32 %v1799_v61, %v2279_v46  ;;  %v1195_v18 = vmax.f32 %v1193_v27, %v1194_v8 }
 0x10e   :  { %v1951_v58 = vpop.eup %1950  ;;  %v1046_v63 = vmul.f32 1.442695, %v1029_v26  ;;  %v1163_v53 = vsel %vm1091_vm7, %v2266_v50, %v1151_v4  ;;  %1341 = vmatpush.msrb.mxu2 %v1267_v34 }
 0x10f   :  { %v1062_v0 = vadd.f32 1.0, %v1951_v58  ;;  %v1000_v1 = vpop.f32.mrf.mxu2  ;;  %v1181_v21 = vadd.f32 %v1169_v38, %v1163_v53  ;;  %v1196_v33 = vrot.slane %v1195_v18, 2  ;;  %v1266_v38 = vld [vmem:[#allocation10 + $0x130] sm:$0xff] }
 0x110   :  { %v1019_v2 = vpop.f32.mrf.mxu3  ;;  %1954 = vpow2.f32 %v1046_v63  ;;  %v1001_v5 = vadd.f32 %v1000_v1, %v982_v52  ;;  %v964_v7 = vpop.f32.mrf.mxu0  ;;  %1342 = vmatpush.msrb.mxu2 %v1266_v38  ;;  %v1261_v1 = vld [vmem:[#allocation10 + $0x108] sm:$0xff] }
 0x111   :  { %v965_v13 = vadd.f32 %v964_v7, %v2274_v25  ;;  %v1074_v48 = vmul.f32 %v1062_v0, %v1062_v0  ;;  %v983_v57 = vpop.f32.mrf.mxu1  ;;  %v1197_v39 = vmax.f32 %v1195_v18, %v1196_v33  ;;  %v1260_v7 = vld [vmem:[#allocation10 + $0x100] sm:$0xff] }
 0x112   :  { %v2302_v11 = vadd.f32 %v1019_v2, %v1001_v5 }
 0x113   :  { %v1953_v14 = vpop.eup %1952  ;;  %v984_v20 = vadd.f32 %v983_v57, %v965_v13  ;;  %v1122_v23 = vadd.f32 1.0, %v1074_v48  ;;  %v1791_v41 = vadd.f32 -1.0, %v1074_v48  ;;  %v1198_v44 = vrot.slane %v1197_v39, 1 }
 0x114   :  { %v1154_v54 = vmul.f32 %v1953_v14, %v1118_v10  ;;  %v1032_v17 = vmin.f32 %v2302_v11, 20.0  ;;  %v1173_v10 = vld [vmem:[#allocation8 + $0x28] sm:$0xff]  ;;  %vm1092_vm11 = vcmp.gt.f32.partialorder %v2302_v11, 20.0 }
 0x115   :  { %v1110_v58 = vmul.f32 %v1791_v41, %v2284_v16  ;;  %v1199_v4 = vmax.f32 %v1197_v39, %v1198_v44 }
 0x116   :  { %v1955_v19 = vpop.eup %1954  ;;  %v1166_v25 = vsel %vm1094_vm8, %v2279_v46, %v1154_v54  ;;  %v1052_v56 = vmul.f32 1.442695, %v1032_v17 }
 0x117   :  { %v1184_v22 = vadd.f32 %v2290_v29, %v1166_v25  ;;  %v1065_v50 = vadd.f32 1.0, %v1955_v19  ;;  %v1002_v24 = vpop.f32.mrf.mxu2  ;;  %v1265_v29 = vld [vmem:[#allocation10 + $0x128] sm:$0xff] }
 0x118   :  { %1956 = vpow2.f32 %v1052_v56  ;;  %v1003_v60 = vadd.f32 %v1002_v24, %v984_v20  ;;  %v1021_v32 = vpop.f32.mrf.mxu3  ;;  %1343 = vmatpush.msrb.mxu2 %v1265_v29 }
 0x119   :  { %v1214_v43 = vmax.f32 %v1181_v21, %v1184_v22  ;;  %v1077_v30 = vmul.f32 %v1065_v50, %v1065_v50  ;;  %1958 = vrcp.f32 %v1122_v23 }
 0x11a   :  { %v2311_v35 = vadd.f32 %v1021_v32, %v1003_v60  ;;  %1344 = vmatpush.msrb.mxu2 %v1264_v6 }
 0x11b   :  { %v1215_v46 = vrot.slane %v1214_v43, 4  ;;  %v1125_v36 = vadd.f32 1.0, %v1077_v30  ;;  %v1794_v42 = vadd.f32 -1.0, %v1077_v30 }
 0x11c   :  { %v1035_v62 = vmin.f32 %v2311_v35, 20.0  ;;  %1345 = vmatpush.msrb.mxu2 %v1263_v49  ;;  %vm1095_vm12 = vcmp.gt.f32.partialorder %v2311_v35, 20.0 }
 0x11d   :  { %1960 = vrcp.f32 %v1125_v36  ;;  %v1216_v40 = vmax.f32 %v1214_v43, %v1215_v46  ;;  %v1113_v59 = vmul.f32 %v1794_v42, %v2297_v37 }
 0x11e   :  { %v1957_v12 = vpop.eup %1956  ;;  %v1058_v45 = vmul.f32 1.442695, %v1035_v62  ;;  %1346 = vmatpush.msrb.mxu2 %v1262_v55 }
 0x11f   :  { %v1068_v31 = vadd.f32 1.0, %v1957_v12  ;;  %v1217_v47 = vrot.slane %v1216_v40, 2  ;;  %v1959_v26 = vpop.eup %1958 }
 0x120   :  { %1962 = vpow2.f32 %v1058_v45  ;;  %v1146_v2 = vmul.f32 %v1959_v26, %v1110_v58  ;;  %1347 = vmatpush.msrb.mxu2 %v1261_v1 }
 0x121   :  { %v1080_v52 = vmul.f32 %v1068_v31, %v1068_v31  ;;  %v1218_v27 = vmax.f32 %v1216_v40, %v1217_v47 }
 0x122   :  { %v1158_v48 = vsel %vm1086_vm10, %v2284_v16, %v1146_v2  ;;  %1348 = vmatpush.msrb.mxu2 %v1260_v7 }
 0x123   :  { %v1961_v61 = vpop.eup %1960  ;;  %v1128_v63 = vadd.f32 1.0, %v1080_v52  ;;  %v1219_v0 = vrot.slane %v1218_v27, 1  ;;  %v1797_v17 = vadd.f32 -1.0, %v1080_v52  ;;  %v1176_v57 = vadd.f32 %v1170_v15, %v1158_v48 }
 0x124   :  { %v1149_v3 = vmul.f32 %v1961_v61, %v1113_v59 }
 0x125   :  { %v1220_v5 = vmax.f32 %v1218_v27, %v1219_v0  ;;  %1964 = vrcp.f32 %v1128_v63  ;;  %v1116_v19 = vmul.f32 %v1797_v17, %v2302_v11 }
 0x126   :  { %v1963_v8 = vpop.eup %1962  ;;  %v1161_v9 = vsel %vm1089_vm9, %v2297_v37, %v1149_v3 }
 0x127   :  { %v1071_v13 = vadd.f32 1.0, %v1963_v8  ;;  %v1288_v14 = vsel %vm1286_vm4, %v1220_v5, %v1199_v4  ;;  %v1179_v53 = vadd.f32 %v1173_v10, %v1161_v9 }
 0x128   :  { %1329 = vmatmul.f32.vlgmr.msrb.gmra.mxu1 %v1288_v14 }
 0x129   :  { %v1083_v54 = vmul.f32 %v1071_v13, %v1071_v13  ;;  %v1200_v37 = vmax.f32 %v1176_v57, %v1179_v53 }
 0x12b   :  { %v1131_v18 = vadd.f32 1.0, %v1083_v54  ;;  %v1965_v51 = vpop.eup %1964  ;;  %v1800_v25 = vadd.f32 -1.0, %v1083_v54  ;;  %v1201_v20 = vrot.slane %v1200_v37, 4 }
 0x12c   :  { %v1152_v56 = vmul.f32 %v1965_v51, %v1116_v19 }
 0x12d   :  { %1966 = vrcp.f32 %v1131_v18  ;;  %v1119_v21 = vmul.f32 %v1800_v25, %v2311_v35  ;;  %v1202_v50 = vmax.f32 %v1200_v37, %v1201_v20 }
 0x12e   :  { %v1164_v16 = vsel %vm1092_vm11, %v2302_v11, %v1152_v56 }
 0x12f   :  { %v1182_v28 = vadd.f32 %v1170_v15, %v1164_v16  ;;  %v1203_v30 = vrot.slane %v1202_v50, 2 }
 0x131   :  { %v1204_v33 = vmax.f32 %v1202_v50, %v1203_v30 }
 0x133   :  { %v1967_v22 = vpop.eup %1966  ;;  %v1205_v36 = vrot.slane %v1204_v33, 1 }
 0x134   :  { %v1155_v23 = vmul.f32 %v1967_v22, %v1119_v21 }
 0x135   :  { %v1206_v62 = vmax.f32 %v1204_v33, %v1205_v36 }
 0x136   :  { %v1167_v24 = vsel %vm1095_vm12, %v2311_v35, %v1155_v23  ;;  %v1919_v35 = vld [vmem:[%s2339_s5] ss:$0 sm:$0xff] }
 0x137   :  { %v1185_v60 = vadd.f32 %v1173_v10, %v1167_v24 }
 0x139   :  { %v1221_v43 = vmax.f32 %v1182_v28, %v1185_v60 }
 0x13b   :  { %v1222_v32 = vrot.slane %v1221_v43, 4 }
 0x13d   :  { %v1223_v34 = vmax.f32 %v1221_v43, %v1222_v32 }
 0x13f   :  { %v1224_v46 = vrot.slane %v1223_v34, 2 }
 0x141   :  { %v1225_v38 = vmax.f32 %v1223_v34, %v1224_v46 }
 0x143   :  { %v1226_v29 = vrot.slane %v1225_v38, 1 }
 0x145   :  { %v1227_v39 = vmax.f32 %v1225_v38, %v1226_v29 }
 0x147   :  { %v1289_v11 = vsel %vm1286_vm4, %v1227_v39, %v1206_v62 }
 0x148   :  { %1349 = vmatmul.f32.vlgmr.msrb.gmra.mxu2 %v1289_v11 }
 0x185   :  { %v1310_v40 = vpop.f32.mrf.mxu0 }
 0x186   :  { %v1311_v12 = vadd.f32 %v1919_v35, %v1310_v40 }
 0x1a5   :  { %v1330_v6 = vpop.f32.mrf.mxu1 }
 0x1a6   :  { %v1331_v41 = vadd.f32 %v1330_v6, %v1311_v12 }
 0x1cb   :  { %v1350_v42 = vpop.f32.mrf.mxu2 }
 0x1cc   :  { %v1351_v45 = vadd.f32 %v1350_v42, %v1331_v41 }
 0x1ce   :  { %1353 = vst [vmem:[#allocation11] sm:$0x3] %v1351_v45 }
 0x1cf   :  { %1364 = dma.vmem_to_hbm [thread:$0]  %s1360_s28, 32, %s1362_s7, [#allocation4]  }
 0x1d0   :  { %2118 = dma.done.wait [#allocation4], 32  }
 0x1d1   :  { %2119 = vsyncadd [#allocation4], 4294967264 }
 0x1d2   :  { %1369 = vsyncpa [#allocation3], 1 }
 0x1d3   :  { %1370 = vsyncpa [#allocation6], 1 }
 0x1d4   :  { %1371 = vsyncpa [#allocation9], 1 }
 0x1d5   :  { %1372 = vsyncpa [#allocation4], 1 }

</bundles_post_ra>
